<compile_context>
chip_gen: v7x
topology: tpu7x:2x2x1
jax: 0.10.0
libtpu: 0.0.40
codegen_flags: <defaults>
</compile_context>

<pallas_src>
import math
import numpy as np
import jax
import jax.numpy as jnp
from jax.experimental import pallas as pl
from jax.experimental.pallas import tpu as pltpu

# ----- model hyper-parameters (small, consistent with the module) -----
LANE = 128                                  # lane width everything is padded to
NFEAT, NHID, NCLASS = 8, 32, 4
NLAYERS = 3
GRAPH_SIZE = 16                             # N nodes per graph
GRAPHS_PER_BLOCK = 8                        # graphs packed into one grid step
M_NODES = GRAPHS_PER_BLOCK * GRAPH_SIZE     # 128 nodes per super-block
BATCH = 16                                  # total graphs
NUM_BLOCKS = BATCH // GRAPHS_PER_BLOCK      # 2 grid steps (>= 2 for v7x megacore)
DT, ALPHA = 1.0, 1.0                        # module defaults

# ----- parameter-slab row layout (8-row aligned sections, 128 lanes wide) -----
W_ENC_ROW = 0                    # rows   0:8   -> W_enc  [NFEAT, NHID] (lanes 0:NHID)
VEC_ROW = 8                      # rows   8:16  -> bias / coeff rows
B_ENC_ROW = VEC_ROW + 0          #   row  8     -> b_enc
B_CR_ROW = VEC_ROW + 1           #   row  9     -> b_conv - b_res
COEFF_ROW = VEC_ROW + 2          #   rows 10:13 -> (1 + tanh(eps_i)) - dt*alpha
B_DEC_ROW = VEC_ROW + 5          #   row  13    -> b_dec (lanes 0:NCLASS)
W_CONV_ROW = 16                  # rows  16:144 -> W_conv padded to [128, 128]
W_RES_ROW = 144                  # rows 144:272 -> W_res  padded to [128, 128]
W_DEC_ROW = 272                  # rows 272:400 -> W_dec  padded to [128, 128]
SLAB_ROWS = 400


# ----------------------------- Pallas kernel -----------------------------
def _lap_gcn_kernel(x_ref, a_ref, slab_ref, out_ref):
    A = a_ref[...]                                                 # [M, M] block-diag A_hat

    # ---- encoder: X = relu(x @ W_enc + b_enc); X carried 128-lane wide,
    #      lanes NHID:128 are exactly zero and stay zero through every layer ----
    X = jnp.maximum(
        jnp.dot(x_ref[...], slab_ref[W_ENC_ROW:W_ENC_ROW + NFEAT, :],
                preferred_element_type=jnp.float32)
        + slab_ref[B_ENC_ROW:B_ENC_ROW + 1, :], 0.0)               # [M, 128]

    # hoisted once (used every layer; JAX does not CSE broadcast_in_dim)
    b_cr = jnp.broadcast_to(slab_ref[B_CR_ROW:B_CR_ROW + 1, :], (M_NODES, LANE))

    # ---- statically unrolled layer loop; X stays resident in vregs ----
    for i in range(NLAYERS):
        w_conv = slab_ref[W_CONV_ROW:W_CONV_ROW + LANE, :]         # [128, 128] zero-padded
        w_res = slab_ref[W_RES_ROW:W_RES_ROW + LANE, :]            # [128, 128] zero-padded
        XW = jnp.dot(X, w_conv, preferred_element_type=jnp.float32)    # X @ W_conv
        XWr = jnp.dot(XW, w_res, preferred_element_type=jnp.float32)   # (X@W_conv) @ W_res
        # relu(conv(X) + residual_v1(X)) = relu(A_hat @ XW + (b_conv - b_res) - XWr)
        ax2 = jnp.maximum(
            jnp.dot(A, XW, preferred_element_type=jnp.float32) + b_cr - XWr, 0.0)
        # X_new = X*(1+tanh(eps_i)) + dt*(ax2 - alpha*X) = X*coeff_i + dt*ax2
        X = X * slab_ref[COEFF_ROW + i:COEFF_ROW + i + 1, :] + DT * ax2

    # ---- decoder: lane-dense [M, 128] write (wrapper slices back to NCLASS) ----
    out_ref[...] = (jnp.dot(X, slab_ref[W_DEC_ROW:W_DEC_ROW + LANE, :],
                            preferred_element_type=jnp.float32)
                    + slab_ref[B_DEC_ROW:B_DEC_ROW + 1, :])


# --------------------------- host-side packing ---------------------------
def pack_param_slab(p):
    """Fold parameter-only math and pack all parameters into one 128-lane slab."""
    slab = np.zeros((SLAB_ROWS, LANE), np.float32)
    w_enc, b_enc = np.asarray(p['w_enc']), np.asarray(p['b_enc'])
    w_conv, b_conv = np.asarray(p['w_conv']), np.asarray(p['b_conv'])
    w_res, b_res = np.asarray(p['w_res']), np.asarray(p['b_res'])
    w_dec, b_dec = np.asarray(p['w_dec']), np.asarray(p['b_dec'])
    eps = np.asarray(p['eps'])

    slab[W_ENC_ROW:W_ENC_ROW + NFEAT, :NHID] = w_enc
    slab[B_ENC_ROW, :NHID] = b_enc[0]
    slab[B_CR_ROW, :NHID] = (b_conv - b_res)[0]
    slab[COEFF_ROW:COEFF_ROW + NLAYERS, :NHID] = (1.0 + np.tanh(eps)) - DT * ALPHA
    slab[B_DEC_ROW, :NCLASS] = b_dec[0]
    slab[W_CONV_ROW:W_CONV_ROW + NHID, :NHID] = w_conv
    slab[W_RES_ROW:W_RES_ROW + NHID, :NHID] = w_res
    slab[W_DEC_ROW:W_DEC_ROW + NHID, :NCLASS] = w_dec
    return jnp.asarray(slab)


def lap_gcn_forward(x, a_hat, slab):
    """x: [B, N, NFEAT], a_hat: [B, N, N] (per-graph gcn_norm adjacency) -> [B, N, NCLASS]."""
    B, N, F = x.shape
    assert B % GRAPHS_PER_BLOCK == 0 and N == GRAPH_SIZE
    nblocks = B // GRAPHS_PER_BLOCK
    M = GRAPHS_PER_BLOCK * N

    # pack G graphs per 128-node super-block; block-diagonal adjacency per block
    xb = jnp.reshape(x, (nblocks, M, F))
    a_np = np.asarray(a_hat)
    ab = np.zeros((nblocks, M, M), np.float32)
    for blk in range(nblocks):
        for g in range(GRAPHS_PER_BLOCK):
            r = g * N
            ab[blk, r:r + N, r:r + N] = a_np[blk * GRAPHS_PER_BLOCK + g]
    ab = jnp.asarray(ab)

    out_pad = pl.pallas_call(
        _lap_gcn_kernel,
        out_shape=jax.ShapeDtypeStruct((nblocks, M, LANE), jnp.float32),
        grid=(nblocks,),
        in_specs=[
            pl.BlockSpec((None, M, F), lambda b: (b, 0, 0)),       # node features (per block)
            pl.BlockSpec((None, M, M), lambda b: (b, 0, 0)),       # block-diag A_hat
            pl.BlockSpec((SLAB_ROWS, LANE), lambda b: (0, 0)),     # packed parameter slab
        ],
        out_specs=pl.BlockSpec((None, M, LANE), lambda b: (b, 0, 0)),
        compiler_params=pltpu.CompilerParams(
            dimension_semantics=("parallel",)),                    # megacore sharding on v7x
    )(xb, ab, slab)

    return jnp.reshape(out_pad, (B, N, LANE))[..., :NCLASS]


# ------------------------------ host glue ------------------------------
def build_graph(n, extra_edges=()):
    """Undirected ring (+ optional chords) + add_remaining_self_loops, densified
    into the gcn_norm adjacency A_hat[t, s] = d_s^-1/2 d_t^-1/2."""
    src, dst = [], []
    for i in range(n):
        src += [i, (i + 1) % n]
        dst += [(i + 1) % n, i]
    for a, b in extra_edges:
        src += [a, b]
        dst += [b, a]
    for i in range(n):                      # add_remaining_self_loops
        src.append(i)
        dst.append(i)
    src, dst = np.asarray(src), np.asarray(dst)

    deg = np.zeros(n, np.float64)
    np.add.at(deg, dst, 1.0)                # in-degree incl. self loop
    dinv = 1.0 / np.sqrt(deg)

    a_hat = np.zeros((n, n), np.float32)    # [target, source] normalized
    for s, t in zip(src, dst):
        a_hat[t, s] += dinv[s] * dinv[t]
    return jnp.asarray(a_hat)


def init_params(key):
    ks = jax.random.split(key, 9)
    s = 1.0 / math.sqrt(NHID)               # reset_params: stdv = 1/sqrt(nhid)
    u = lambda k, shape, sc: jax.random.uniform(k, shape, jnp.float32, -sc, sc)
    return dict(
        w_enc=u(ks[0], (NFEAT, NHID), s), b_enc=u(ks[1], (1, NHID), s),
        w_conv=u(ks[2], (NHID, NHID), s), b_conv=u(ks[3], (1, NHID), s),
        w_res=u(ks[4], (NHID, NHID), s), b_res=u(ks[5], (1, NHID), s),
        # epsilons are zeros at init; small nonzero values exercise the tanh path
        eps=u(ks[6], (NLAYERS, NHID), 0.1),
        w_dec=u(ks[7], (NHID, NCLASS), s), b_dec=u(ks[8], (1, NCLASS), s),
    )


def reference_forward_single(x, a_hat, p):
    """Pure-JAX reference for ONE graph, mirroring the PyTorch forward (eval mode,
    where X0 == X after every iteration)."""
    X = jax.nn.relu(x @ p['w_enc'] + p['b_enc'])
    for i in range(NLAYERS):
        coeff = 1.0 + jnp.tanh(p['eps'][i:i + 1, :])        # (1 + tanh(eps_i)).T, tiled
        XW = X @ p['w_conv']
        conv_out = a_hat @ XW + p['b_conv']                 # GCNConv
        resid = -(XW @ p['w_res'] + p['b_res'])             # res_connection_v1
        X = X * coeff + DT * (jax.nn.relu(conv_out + resid) - ALPHA * X)
    return X @ p['w_dec'] + p['b_dec']


if __name__ == "__main__":
    key = jax.random.PRNGKey(0)
    k_x, k_p = jax.random.split(key)

    # 16 small graphs: a ring plus a per-graph chord so every A_hat differs
    x = jax.random.normal(k_x, (BATCH, GRAPH_SIZE, NFEAT), jnp.float32)
    a_hat = jnp.stack([
        build_graph(GRAPH_SIZE,
                    extra_edges=((g % GRAPH_SIZE, (g + GRAPH_SIZE // 2) % GRAPH_SIZE),))
        for g in range(BATCH)
    ])
    params = init_params(k_p)
    slab = pack_param_slab(params)

    out = lap_gcn_forward(x, a_hat, slab)
    out = jax.block_until_ready(out)

    ref = jax.vmap(reference_forward_single, in_axes=(0, 0, None))(x, a_hat, params)
    assert out.shape == (BATCH, GRAPH_SIZE, NCLASS)
    err = float(np.max(np.abs(np.asarray(out) - np.asarray(ref))))
    assert np.allclose(np.asarray(out), np.asarray(ref), rtol=1e-3, atol=2e-3), err

    print("KERNEL_OK")
</pallas_src>

<mosaic_0001>
module attributes {stable_mosaic.version = 11 : i64} {
  func.func @_lap_gcn_kernel(%arg0: i32, %arg1: memref<1x128x8xf32, #tpu.memory_space<vmem>>, %arg2: memref<1x128x128xf32, #tpu.memory_space<vmem>>, %arg3: memref<400x128xf32, #tpu.memory_space<vmem>>, %arg4: memref<1x128x128xf32, #tpu.memory_space<vmem>>) attributes {dimension_semantics = [#tpu.dimension_semantics<parallel>], iteration_bounds = array<i64: 2>, scalar_prefetch = 0 : i64, scratch_operands = 0 : i64, tpu.core_type = #tpu.core_type<tc>, window_params = [{transform_indices = @transform_0, window_bounds = array<i64: 1, 128, 8>}, {transform_indices = @transform_1, window_bounds = array<i64: 1, 128, 128>}, {pipeline_mode = #tpu.pipeline_mode<synchronous>, transform_indices = @transform_2, window_bounds = array<i64: 400, 128>}, {transform_indices = @transform_3, window_bounds = array<i64: 1, 128, 128>}]} {
    %c0 = arith.constant 0 : index
    %c0_0 = arith.constant 0 : index
    %c0_1 = arith.constant 0 : index
    %0 = vector.load %arg2[%c0, %c0_0, %c0_1] : memref<1x128x128xf32, #tpu.memory_space<vmem>>, vector<1x128x128xf32>
    %1 = vector.shape_cast %0 : vector<1x128x128xf32> to vector<128x128xf32>
    %c0_2 = arith.constant 0 : index
    %c0_3 = arith.constant 0 : index
    %c0_4 = arith.constant 0 : index
    %2 = vector.load %arg1[%c0_2, %c0_3, %c0_4] : memref<1x128x8xf32, #tpu.memory_space<vmem>>, vector<1x128x8xf32>
    %3 = vector.shape_cast %2 : vector<1x128x8xf32> to vector<128x8xf32>
    %c0_5 = arith.constant 0 : index
    %c0_6 = arith.constant 0 : index
    %4 = vector.load %arg3[%c0_5, %c0_6] : memref<400x128xf32, #tpu.memory_space<vmem>>, vector<8x128xf32>
    %cst = arith.constant dense<0.000000e+00> : vector<128x128xf32>
    %5 = tpu.matmul %3, %4, %cst {dimension_numbers = #tpu.dot_dimension_numbers<[1], [0], [0], [1], [0, 0, 1, 1], [], []>} : vector<128x8xf32>, vector<8x128xf32>, vector<128x128xf32> -> vector<128x128xf32>
    %c8 = arith.constant 8 : index
    %c0_7 = arith.constant 0 : index
    %6 = vector.load %arg3[%c8, %c0_7] : memref<400x128xf32, #tpu.memory_space<vmem>>, vector<1x128xf32>
    %7 = vector.broadcast %6 : vector<1x128xf32> to vector<128x128xf32>
    %8 = arith.addf %5, %7 : vector<128x128xf32>
    %cst_8 = arith.constant 0.000000e+00 : f32
    %9 = vector.broadcast %cst_8 : f32 to vector<128x128xf32>
    %10 = arith.maximumf %8, %9 : vector<128x128xf32>
    %c9 = arith.constant 9 : index
    %c0_9 = arith.constant 0 : index
    %11 = vector.load %arg3[%c9, %c0_9] : memref<400x128xf32, #tpu.memory_space<vmem>>, vector<1x128xf32>
    %12 = vector.shape_cast %11 : vector<1x128xf32> to vector<1x128xf32>
    %13 = vector.broadcast %12 : vector<1x128xf32> to vector<128x128xf32>
    %c16 = arith.constant 16 : index
    %c0_10 = arith.constant 0 : index
    %14 = vector.load %arg3[%c16, %c0_10] : memref<400x128xf32, #tpu.memory_space<vmem>>, vector<128x128xf32>
    %c144 = arith.constant 144 : index
    %c0_11 = arith.constant 0 : index
    %15 = vector.load %arg3[%c144, %c0_11] : memref<400x128xf32, #tpu.memory_space<vmem>>, vector<128x128xf32>
    %cst_12 = arith.constant dense<0.000000e+00> : vector<128x128xf32>
    %16 = tpu.matmul %10, %14, %cst_12 {dimension_numbers = #tpu.dot_dimension_numbers<[1], [0], [0], [1], [0, 0, 1, 1], [], []>} : vector<128x128xf32>, vector<128x128xf32>, vector<128x128xf32> -> vector<128x128xf32>
    %cst_13 = arith.constant dense<0.000000e+00> : vector<128x128xf32>
    %17 = tpu.matmul %16, %15, %cst_13 {dimension_numbers = #tpu.dot_dimension_numbers<[1], [0], [0], [1], [0, 0, 1, 1], [], []>} : vector<128x128xf32>, vector<128x128xf32>, vector<128x128xf32> -> vector<128x128xf32>
    %cst_14 = arith.constant dense<0.000000e+00> : vector<128x128xf32>
    %18 = tpu.matmul %1, %16, %cst_14 {dimension_numbers = #tpu.dot_dimension_numbers<[1], [0], [0], [1], [0, 0, 1, 1], [], []>} : vector<128x128xf32>, vector<128x128xf32>, vector<128x128xf32> -> vector<128x128xf32>
    %19 = arith.addf %18, %13 : vector<128x128xf32>
    %20 = arith.subf %19, %17 : vector<128x128xf32>
    %cst_15 = arith.constant 0.000000e+00 : f32
    %21 = vector.broadcast %cst_15 : f32 to vector<128x128xf32>
    %22 = arith.maximumf %20, %21 : vector<128x128xf32>
    %c10 = arith.constant 10 : index
    %c0_16 = arith.constant 0 : index
    %23 = vector.load %arg3[%c10, %c0_16] : memref<400x128xf32, #tpu.memory_space<vmem>>, vector<1x128xf32>
    %24 = vector.broadcast %23 : vector<1x128xf32> to vector<128x128xf32>
    %25 = arith.mulf %10, %24 : vector<128x128xf32>
    %cst_17 = arith.constant 1.000000e+00 : f32
    %26 = vector.broadcast %cst_17 : f32 to vector<128x128xf32>
    %27 = arith.mulf %26, %22 : vector<128x128xf32>
    %28 = arith.addf %25, %27 : vector<128x128xf32>
    %c16_18 = arith.constant 16 : index
    %c0_19 = arith.constant 0 : index
    %29 = vector.load %arg3[%c16_18, %c0_19] : memref<400x128xf32, #tpu.memory_space<vmem>>, vector<128x128xf32>
    %c144_20 = arith.constant 144 : index
    %c0_21 = arith.constant 0 : index
    %30 = vector.load %arg3[%c144_20, %c0_21] : memref<400x128xf32, #tpu.memory_space<vmem>>, vector<128x128xf32>
    %cst_22 = arith.constant dense<0.000000e+00> : vector<128x128xf32>
    %31 = tpu.matmul %28, %29, %cst_22 {dimension_numbers = #tpu.dot_dimension_numbers<[1], [0], [0], [1], [0, 0, 1, 1], [], []>} : vector<128x128xf32>, vector<128x128xf32>, vector<128x128xf32> -> vector<128x128xf32>
    %cst_23 = arith.constant dense<0.000000e+00> : vector<128x128xf32>
    %32 = tpu.matmul %31, %30, %cst_23 {dimension_numbers = #tpu.dot_dimension_numbers<[1], [0], [0], [1], [0, 0, 1, 1], [], []>} : vector<128x128xf32>, vector<128x128xf32>, vector<128x128xf32> -> vector<128x128xf32>
    %cst_24 = arith.constant dense<0.000000e+00> : vector<128x128xf32>
    %33 = tpu.matmul %1, %31, %cst_24 {dimension_numbers = #tpu.dot_dimension_numbers<[1], [0], [0], [1], [0, 0, 1, 1], [], []>} : vector<128x128xf32>, vector<128x128xf32>, vector<128x128xf32> -> vector<128x128xf32>
    %34 = arith.addf %33, %13 : vector<128x128xf32>
    %35 = arith.subf %34, %32 : vector<128x128xf32>
    %cst_25 = arith.constant 0.000000e+00 : f32
    %36 = vector.broadcast %cst_25 : f32 to vector<128x128xf32>
    %37 = arith.maximumf %35, %36 : vector<128x128xf32>
    %c11 = arith.constant 11 : index
    %c0_26 = arith.constant 0 : index
    %38 = vector.load %arg3[%c11, %c0_26] : memref<400x128xf32, #tpu.memory_space<vmem>>, vector<1x128xf32>
    %39 = vector.broadcast %38 : vector<1x128xf32> to vector<128x128xf32>
    %40 = arith.mulf %28, %39 : vector<128x128xf32>
    %cst_27 = arith.constant 1.000000e+00 : f32
    %41 = vector.broadcast %cst_27 : f32 to vector<128x128xf32>
    %42 = arith.mulf %41, %37 : vector<128x128xf32>
    %43 = arith.addf %40, %42 : vector<128x128xf32>
    %c16_28 = arith.constant 16 : index
    %c0_29 = arith.constant 0 : index
    %44 = vector.load %arg3[%c16_28, %c0_29] : memref<400x128xf32, #tpu.memory_space<vmem>>, vector<128x128xf32>
    %c144_30 = arith.constant 144 : index
    %c0_31 = arith.constant 0 : index
    %45 = vector.load %arg3[%c144_30, %c0_31] : memref<400x128xf32, #tpu.memory_space<vmem>>, vector<128x128xf32>
    %cst_32 = arith.constant dense<0.000000e+00> : vector<128x128xf32>
    %46 = tpu.matmul %43, %44, %cst_32 {dimension_numbers = #tpu.dot_dimension_numbers<[1], [0], [0], [1], [0, 0, 1, 1], [], []>} : vector<128x128xf32>, vector<128x128xf32>, vector<128x128xf32> -> vector<128x128xf32>
    %cst_33 = arith.constant dense<0.000000e+00> : vector<128x128xf32>
    %47 = tpu.matmul %46, %45, %cst_33 {dimension_numbers = #tpu.dot_dimension_numbers<[1], [0], [0], [1], [0, 0, 1, 1], [], []>} : vector<128x128xf32>, vector<128x128xf32>, vector<128x128xf32> -> vector<128x128xf32>
    %cst_34 = arith.constant dense<0.000000e+00> : vector<128x128xf32>
    %48 = tpu.matmul %1, %46, %cst_34 {dimension_numbers = #tpu.dot_dimension_numbers<[1], [0], [0], [1], [0, 0, 1, 1], [], []>} : vector<128x128xf32>, vector<128x128xf32>, vector<128x128xf32> -> vector<128x128xf32>
    %49 = arith.addf %48, %13 : vector<128x128xf32>
    %50 = arith.subf %49, %47 : vector<128x128xf32>
    %cst_35 = arith.constant 0.000000e+00 : f32
    %51 = vector.broadcast %cst_35 : f32 to vector<128x128xf32>
    %52 = arith.maximumf %50, %51 : vector<128x128xf32>
    %c12 = arith.constant 12 : index
    %c0_36 = arith.constant 0 : index
    %53 = vector.load %arg3[%c12, %c0_36] : memref<400x128xf32, #tpu.memory_space<vmem>>, vector<1x128xf32>
    %54 = vector.broadcast %53 : vector<1x128xf32> to vector<128x128xf32>
    %55 = arith.mulf %43, %54 : vector<128x128xf32>
    %cst_37 = arith.constant 1.000000e+00 : f32
    %56 = vector.broadcast %cst_37 : f32 to vector<128x128xf32>
    %57 = arith.mulf %56, %52 : vector<128x128xf32>
    %58 = arith.addf %55, %57 : vector<128x128xf32>
    %c272 = arith.constant 272 : index
    %c0_38 = arith.constant 0 : index
    %59 = vector.load %arg3[%c272, %c0_38] : memref<400x128xf32, #tpu.memory_space<vmem>>, vector<128x128xf32>
    %cst_39 = arith.constant dense<0.000000e+00> : vector<128x128xf32>
    %60 = tpu.matmul %58, %59, %cst_39 {dimension_numbers = #tpu.dot_dimension_numbers<[1], [0], [0], [1], [0, 0, 1, 1], [], []>} : vector<128x128xf32>, vector<128x128xf32>, vector<128x128xf32> -> vector<128x128xf32>
    %c13 = arith.constant 13 : index
    %c0_40 = arith.constant 0 : index
    %61 = vector.load %arg3[%c13, %c0_40] : memref<400x128xf32, #tpu.memory_space<vmem>>, vector<1x128xf32>
    %62 = vector.broadcast %61 : vector<1x128xf32> to vector<128x128xf32>
    %63 = arith.addf %60, %62 : vector<128x128xf32>
    %c0_41 = arith.constant 0 : index
    %c0_42 = arith.constant 0 : index
    %c0_43 = arith.constant 0 : index
    %64 = vector.load %arg4[%c0_41, %c0_42, %c0_43] : memref<1x128x128xf32, #tpu.memory_space<vmem>>, vector<1x128x128xf32>
    %65 = vector.shape_cast %64 : vector<1x128x128xf32> to vector<128x128xf32>
    %66 = vector.shape_cast %63 : vector<128x128xf32> to vector<1x128x128xf32>
    tpu.vector_store %arg4[%c0_41, %c0_42, %c0_43], %66 {strides = array<i32>} : memref<1x128x128xf32, #tpu.memory_space<vmem>>, vector<1x128x128xf32>,
    return
  }
  func.func @transform_0(%arg0: i32) -> (i32, i32, i32) {
    %c0_i32 = arith.constant 0 : i32
    %c0_i32_0 = arith.constant 0 : i32
    %c0_i32_1 = arith.constant 0 : i32
    return %arg0, %c0_i32, %c0_i32_0 : i32, i32, i32
  }
  func.func @transform_1(%arg0: i32) -> (i32, i32, i32) {
    %c0_i32 = arith.constant 0 : i32
    %c0_i32_0 = arith.constant 0 : i32
    %c0_i32_1 = arith.constant 0 : i32
    return %arg0, %c0_i32, %c0_i32_0 : i32, i32, i32
  }
  func.func @transform_2(%arg0: i32) -> (i32, i32) {
    %c0_i32 = arith.constant 0 : i32
    %c0_i32_0 = arith.constant 0 : i32
    %c0_i32_1 = arith.constant 0 : i32
    return %c0_i32, %c0_i32_0 : i32, i32
  }
  func.func @transform_3(%arg0: i32) -> (i32, i32, i32) {
    %c0_i32 = arith.constant 0 : i32
    %c0_i32_0 = arith.constant 0 : i32
    %c0_i32_1 = arith.constant 0 : i32
    return %arg0, %c0_i32, %c0_i32_0 : i32, i32, i32
  }
}

</mosaic_0001>

<bundles_post_ra>
// kernel: tpu_custom_call.1
= control target key start
LH: loop header
LB: loop body
LE: loop exit
PB: predicated region body
PF: predicated region fallthrough
CT: control target
= control target key end

     0   :  { %8 = vsyncpa [#allocation3], 0  ;;  %s4585_s0 = inlined_call_operand.vmem [shape: f32[2,128,8], index: 0, kind: input, shape index: {}]   ;;  %s4586_s1 = inlined_call_operand.vmem [shape: f32[2,128,128], index: 1, kind: input, shape index: {}]   ;;  %s4587_s2 = inlined_call_operand.hbm [shape: f32[400,128], index: 2, kind: input, shape index: {}]   ;;  %s4588_s3 = inlined_call_operand.hbm [shape: f32[2,128,128], index: 3, kind: output, shape index: {}]  }
   0x1   :  { %9 = vsyncpa [#allocation4], 0 }
   0x2   :  { %11 = vsyncpa [#allocation4 + $0x1], 0  ;;  %s3744_s12 = smov 0   ;;  %s3746_s13 = smov 0  }
   0x3   :  { %s3748_s14 = smov 0   ;;  %s3750_s15 = smov 0  }
   0x4 LB: > { %s3765_s16 = sadd.s32 4294967295, %s3716_s15   ;;  %s2283_s17 = sadd.s32 4294967294, %s3716_s15   ;;  %s3716_s15 = sphi %s3750_s15, %s4709_s15   ;;  %s3712_s14 = sphi %s3748_s14, %s4708_s14   ;;  %s3708_s13 = sphi %s3746_s13, %s4707_s13   ;;  %s3704_s12 = sphi %s3744_s12, %s4706_s12  }
   0x5   : > { %s3769_s18 = sadd.s32 1, %s3716_s15   ;;  %s97_s19 = sadd.s32 1, %s3712_s14 }
   0x6   : > { %s94_s20 = ssub.s32 %s3716_s15, %s3769_s18  ;;  %p107_p0 = scmp.ne.s32.totalorder %s3712_s14, %s3708_s13 }
   0x7   : > { %p95_p1 = scmp.eq.s32.totalorder %s94_s20, 0  ;;  %p108_p2 = scmp.eq.s32.totalorder %s3765_s16, 1 }
   0x8   : > { %p113_p3 = scmp.ne.s32.totalorder %s3708_s13, %s3704_s12  ;;  %p114_p4 = scmp.eq.s32.totalorder %s2283_s17, 1 }
   0x9   : > { %s3780_s21 = scalar_select %p95_p1, %s3712_s14, %s97_s19  }
   0xa   : > { %p3782_p5 = por %p108_p2, %p107_p0  ;;  %p3786_p6 = por %p114_p4, %p113_p3 }
   0xb   : > { %p2284_p7 = scmp.ge.s32.totalorder %s3716_s15, 1  ;;  %p121_p8 = scmp.lt.s32.totalorder %s3716_s15, 3 }
   0xc   : > { %s4644_s22 = scalar_select %p3782_p5, 1, 0 }
   0xd   : > { %s4645_s23 = scalar_select %p3786_p6, 1, 0 }
   0xe   : > { %p4589_p9 = scmp.eq.s32.totalorder %s3765_s16, 0  ;;  %p3793_p10 = pnand %p2284_p7, %p121_p8 }
   0xf   : > { %s3718_s25 = smov [#allocation2]   ;;  %s3622_s30 = scalar_lea.hbm %s4587_s2, 6400 }
  0x10   : > { %s4646_s24 = scalar_select %p3793_p10, 1, 0 }
  0x11   : > { %s133_s26 = sshll.u32 %s3718_s25, 4  ;;  %p3573_p11 = pneg %p3793_p10  ;;  %s134_s26 = int_to_ptr.vmem [resolvable:$true] %s133_s26 }
  0x12   : > { %p3623_p13 = scmp.ne.s32.totalorder %s4587_s2, %s3622_s30  ;;  %p3629_p3 = scmp.lt.u32.totalorder %s3622_s30, %s4587_s2 }
  0x13   : > { %p3801_p12 = pnand %p4589_p9, %p3573_p11 }
  0x15   : > { %p3624_p0 = pneg %p3801_p12 }
  0x17   : > { %p3625_p1 = pnand %p3624_p0, %p3623_p13 }
  0x19   : > { %p3626_p2 = pneg %p3625_p1 }
  0x1b   : > { %p3631_p4 = pnand %p3629_p3, %p3626_p2 }
  0x1d   : > { %3634 = shalt.err (!%p3631_p4)
}
  0x1e   : > { %s3635_s8 = scalar_lea.vmem %s134_s26, 6400  ;;  %p3643_p9 = scmp.lt.s32.totalorder %s134_s26, %s134_s26 }
  0x1f   : > { %p3636_p7 = scmp.ne.s32.totalorder %s134_s26, %s3635_s8  ;;  %p3644_p6 = scmp.lt.s32.totalorder %s3635_s8, %s3635_s8 }
  0x21   : > { %p3638_p8 = pnand %p3636_p7, %p3624_p0  ;;  %p3645_p5 = por %p3644_p6, %p3643_p9 }
  0x23   : > { %p3639_p11 = pneg %p3638_p8 }
  0x25   : > { %p3646_p10 = pnand %p3645_p5, %p3639_p11 }
  0x27   : > { %3649 = shalt.err (!%p3646_p10)
}
  0x28   : > { %s3719_s9 = smov 128   ;;  %s3720_s10 = smov 8  }
  0x29   : > { %3576 = dma.hbm_to_vmem [thread:$0]  (!%p3801_p12), %s4587_s2, 6400, %s134_s26, [#allocation3], %s3719_s9, %s3719_s9, %s3720_s10  }
  0x2a   : > { %p4648_p13 = scmp.ne.s32.totalorder %s4646_s24, 0 }
  0x2c   : > { %165 = sbr.rel (%p4648_p13) target bundleno = 1945 (0x799), region = 32 }
  0x33   : > { %p4649_p1 = scmp.eq.s32.totalorder %s3765_s16, 0 }
  0x35   : > { %3695 = dma.done.wait (%p4649_p1), [#allocation3], 6400   ;;  %p4650_p0 = pmov %p4649_p1 }
  0x36   : > { %p194_p5 = scmp.lt.s32.totalorder %s3765_s16, 1  ;;  %vm242_vm0 = vcmask 64512   ;;  %v236_v0 = vld [vmem:[#allocation2] sm:$0xff]  ;;  %v457_v6 = vld [vmem:[#allocation2 + $0x10] sm:$0xff]  ;;  %v458_v7 = vld [vmem:[#allocation2 + $0x18] sm:$0xff]  ;;  %s191_s30 = sand.u32 1, %s3708_s13  }
  0x37   : > { %3697 = vsyncadd (%p4650_p0), [#allocation3], 4294960896  ;;  %2661 = vmatprep.subr.mxu0 %v236_v0  ;;  %v459_v8 = vld [vmem:[#allocation2 + $0x20] sm:$0xff]  ;;  %v460_v9 = vld [vmem:[#allocation2 + $0x28] sm:$0xff]  ;;  %v3848_v10 = vpack.c.bf16 %v458_v7, %v457_v6  ;;  %s2289_s4 = sshll.u32 %s191_s30, 7  ;;  %s2323_s6 = sshll.u32 %s3765_s16, 11 }
  0x38   : > { %s3829_s19 = scalar_select %p194_p5, %s3765_s16, 1  ;;  %2662 = vmatpush3.msra.mxu0 %v236_v0  ;;  %v3850_v11 = vpack.c.bf16 %v460_v9, %v459_v8  ;;  %v461_v13 = vld [vmem:[#allocation2 + $0x30] sm:$0xff]  ;;  %v462_v14 = vld [vmem:[#allocation2 + $0x38] sm:$0xff]  ;;  %v463_v18 = vld [vmem:[#allocation2 + $0x40] sm:$0xff] }
  0x39   : > { %3248 = vmatprep.subr.bf16.mxu1 %v3848_v10  ;;  %v3859_v16 = vpack.c.bf16 %v462_v14, %v461_v13  ;;  %v464_v19 = vld [vmem:[#allocation2 + $0x48] sm:$0xff]  ;;  %v465_v23 = vld [vmem:[#allocation2 + $0x50] sm:$0xff]  ;;  %v466_v24 = vld [vmem:[#allocation2 + $0x58] sm:$0xff]  ;;  %s4515_s5 = scalar_lea.vmem [#allocation5], %s2289_s4  ;;  %s4536_s10 = scalar_lea.hbm %s4588_s3, %s2323_s6 }
  0x3a   : > { %s2321_s20 = sshll.u32 %s3829_s19, 7  ;;  %3250 = vmatpush3.bf16.msra.mxu1 %v3848_v10  ;;  %v3867_v21 = vpack.c.bf16 %v464_v19, %v463_v18  ;;  %v3875_v26 = vpack.c.bf16 %v466_v24, %v465_v23  ;;  %v467_v28 = vld [vmem:[#allocation2 + $0x60] sm:$0xff]  ;;  %v468_v29 = vld [vmem:[#allocation2 + $0x68] sm:$0xff]  ;;  %v469_v33 = vld [vmem:[#allocation2 + $0x70] sm:$0xff]  ;;  %s2197_s7 = sshll.u32 %s4515_s5, 4  ;;  %s4538_s7 = int_to_ptr.vmem [resolvable:$true] %s2197_s7 }
  0x3b   : > { %s3837_s24 = scalar_lea.vmem %s4585_s0, %s2321_s20  ;;  %3252 = vmatprep.subr.bf16.mxu1 %v3850_v11  ;;  %v3883_v31 = vpack.c.bf16 %v468_v29, %v467_v28  ;;  %v470_v34 = vld [vmem:[#allocation2 + $0x78] sm:$0xff]  ;;  %v471_v38 = vld [vmem:[#allocation2 + $0x80] sm:$0xff]  ;;  %v472_v39 = vld [vmem:[#allocation2 + $0x88] sm:$0xff]  ;;  %s4021_s29 = scalar_lea.vmem %s4586_s1, %s2321_s20 }
  0x3c   : > { %v220_v1 = vld [vmem:[%s3837_s24] sm:$0xff]  ;;  %v221_v2 = vld [vmem:[%s3837_s24 + $0x8] sm:$0xff]  ;;  %v222_v3 = vld [vmem:[%s3837_s24 + $0x10] sm:$0xff]  ;;  %v3891_v36 = vpack.c.bf16 %v470_v34, %v469_v33  ;;  %v3899_v40 = vpack.c.bf16 %v472_v39, %v471_v38  ;;  %s4544_s16 = scalar_lea.sflag [#allocation4], %s191_s30  ;;  %s3650_s11 = scalar_lea.vmem %s4538_s7, 2048 }
  0x3d   : > { %2663 = vmatprep.mubr.msk.f32.mxu0 %vm242_vm0, %v220_v1  ;;  %v223_v4 = vld [vmem:[%s3837_s24 + $0x18] sm:$0xff]  ;;  %v224_v5 = vld [vmem:[%s3837_s24 + $0x20] sm:$0xff]  ;;  %v225_v12 = vld [vmem:[%s3837_s24 + $0x28] sm:$0xff]  ;;  %p3651_p6 = scmp.ne.s32.totalorder %s4538_s7, %s3650_s11  ;;  %p4704_p9 = scmp.ne.s32.totalorder %s4644_s22, 0 }
  0x3e   : > { %2664 = vmatmul.mubr.msk.f32.vlgmr.msra.gmra.mrb[0].mxu0 %vm242_vm0, %v221_v2  ;;  %v226_v15 = vld [vmem:[%s3837_s24 + $0x30] sm:$0xff]  ;;  %v227_v17 = vld [vmem:[%s3837_s24 + $0x38] sm:$0xff]  ;;  %v228_v20 = vld [vmem:[%s3837_s24 + $0x40] sm:$0xff]  ;;  %3254 = vmatpush3.bf16.msra.mxu1 %v3850_v11  ;;  %s3721_s17 = smov [#allocation5]  }
  0x3f   : > { %2666 = vmatprep.mubr.msk.f32.mxu0 %vm242_vm0, %v222_v3  ;;  %3256 = vmatprep.subr.bf16.mxu1 %v3859_v16  ;;  %v229_v22 = vld [vmem:[%s3837_s24 + $0x48] sm:$0xff]  ;;  %v230_v25 = vld [vmem:[%s3837_s24 + $0x50] sm:$0xff]  ;;  %v231_v27 = vld [vmem:[%s3837_s24 + $0x58] sm:$0xff]  ;;  %p3652_p10 = pnand %p3651_p6, %p4704_p9  ;;  %s3654_s19 = sshll.u32 %s3721_s17, 4  ;;  %s3655_s19 = int_to_ptr.vmem [resolvable:$false] %s3654_s19 }
  0x40   : > { %v232_v30 = vld [vmem:[%s3837_s24 + $0x60] sm:$0xff]  ;;  %v233_v32 = vld [vmem:[%s3837_s24 + $0x68] sm:$0xff]  ;;  %v234_v35 = vld [vmem:[%s3837_s24 + $0x70] sm:$0xff]  ;;  %s3656_s20 = scalar_lea.vmem %s3655_s19, 4096  ;;  %p3657_p2 = scmp.lt.s32.totalorder %s4538_s7, %s3655_s19 }
  0x41   : > { %v235_v37 = vld [vmem:[%s3837_s24 + $0x78] sm:$0xff]  ;;  %v473_v41 = vld [vmem:[#allocation2 + $0x90] sm:$0xff]  ;;  %v475_v43 = vld [vmem:[#allocation2 + $0xa0] sm:$0xff]  ;;  %p3653_p12 = pneg %p3652_p10  ;;  %p3658_p3 = scmp.lt.s32.totalorder %s3656_s20, %s3650_s11 }
  0x42   : > { %2667 = vmatmul.mubr.msk.f32.gmra.mrb[2].mxu0 %vm242_vm0, %v223_v4  ;;  %3258 = vmatpush3.bf16.msra.mxu1 %v3859_v16  ;;  %v474_v42 = vld [vmem:[#allocation2 + $0x98] sm:$0xff]  ;;  %v476_v45 = vld [vmem:[#allocation2 + $0xa8] sm:$0xff]  ;;  %v477_v47 = vld [vmem:[#allocation2 + $0xb0] sm:$0xff] }
  0x43   : > { %2669 = vmatprep.mubr.msk.f32.mxu0 %vm242_vm0, %v224_v5  ;;  %3260 = vmatprep.subr.bf16.mxu1 %v3867_v21  ;;  %v3903_v44 = vpack.c.bf16 %v474_v42, %v473_v41  ;;  %v3905_v46 = vpack.c.bf16 %v476_v45, %v475_v43  ;;  %v478_v48 = vld [vmem:[#allocation2 + $0xb8] sm:$0xff]  ;;  %v479_v50 = vld [vmem:[#allocation2 + $0xc0] sm:$0xff]  ;;  %v480_v51 = vld [vmem:[#allocation2 + $0xc8] sm:$0xff]  ;;  %p3659_p4 = por %p3658_p3, %p3657_p2 }
  0x44   : > { %v3910_v49 = vpack.c.bf16 %v478_v48, %v477_v47  ;;  %v3914_v52 = vpack.c.bf16 %v480_v51, %v479_v50  ;;  %v481_v53 = vld [vmem:[#allocation2 + $0xd0] sm:$0xff]  ;;  %v482_v54 = vld [vmem:[#allocation2 + $0xd8] sm:$0xff]  ;;  %v483_v56 = vld [vmem:[#allocation2 + $0xe0] sm:$0xff] }
  0x45   : > { %3280 = vmatprep.subr.bf16.mxu0 %v3903_v44  ;;  %v3918_v55 = vpack.c.bf16 %v482_v54, %v481_v53  ;;  %v484_v57 = vld [vmem:[#allocation2 + $0xe8] sm:$0xff]  ;;  %v485_v59 = vld [vmem:[#allocation2 + $0xf0] sm:$0xff]  ;;  %v486_v60 = vld [vmem:[#allocation2 + $0xf8] sm:$0xff]  ;;  %p3660_p7 = pnand %p3659_p4, %p3653_p12 }
  0x46   : > { %2670 = vmatmul.mubr.msk.f32.gmra.mrb[4].mxu0 %vm242_vm0, %v225_v12  ;;  %3262 = vmatpush3.bf16.msra.mxu1 %v3867_v21  ;;  %4651 = vst [vmem:[#allocation8_spill] sm:$0xff] %v3910_v49  ;;  %4652 = vst [vmem:[#allocation9_spill] sm:$0xff] %v3914_v52  ;;  %v3922_v58 = vpack.c.bf16 %v484_v57, %v483_v56  ;;  %v3926_v61 = vpack.c.bf16 %v486_v60, %v485_v59  ;;  %v487_v62 = vld [vmem:[#allocation2 + $0x100] sm:$0xff]  ;;  %v488_v63 = vld [vmem:[#allocation2 + $0x108] sm:$0xff] }
  0x47   : > { %2672 = vmatprep.mubr.msk.f32.mxu0 %vm242_vm0, %v226_v15  ;;  %3264 = vmatprep.subr.bf16.mxu1 %v3875_v26  ;;  %4653 = vst [vmem:[#allocation10_spill] sm:$0xff] %v3918_v55  ;;  %v3930_v0 = vpack.c.bf16 %v488_v63, %v487_v62  ;;  %v2294_v1 = vld [vmem:[#allocation2 + $0x8] ss:$0 sm:$0xff] }
  0x48   : > { %3282 = vmatpush3.bf16.msra.mxu0 %v3903_v44  ;;  %4654 = vst [vmem:[#allocation11_spill] sm:$0xff] %v3922_v58  ;;  %4655 = vst [vmem:[#allocation12_spill] sm:$0xff] %v3926_v61 }
  0x49   : > { %3284 = vmatprep.subr.bf16.mxu0 %v3905_v46  ;;  %4656 = vst [vmem:[#allocation13_spill] sm:$0xff] %v3930_v0 }
  0x4a   : > { %2673 = vmatmul.mubr.msk.f32.gmra.mrb[6].mxu0 %vm242_vm0, %v227_v17  ;;  %3266 = vmatpush3.bf16.msra.mxu1 %v3875_v26 }
  0x4b   : > { %2675 = vmatprep.mubr.msk.f32.mxu0 %vm242_vm0, %v228_v20  ;;  %3268 = vmatprep.subr.bf16.mxu1 %v3883_v31 }
  0x4c   : > { %3286 = vmatpush3.bf16.msra.mxu0 %v3905_v46 }
  0x4d   : > { %3288 = vmatprep.subr.bf16.mxu0 %v3910_v49 }
  0x4e   : > { %2676 = vmatmul.mubr.msk.f32.gmra.mrb[8].mxu0 %vm242_vm0, %v229_v22  ;;  %3270 = vmatpush3.bf16.msra.mxu1 %v3883_v31 }
  0x4f   : > { %2678 = vmatprep.mubr.msk.f32.mxu0 %vm242_vm0, %v230_v25  ;;  %3272 = vmatprep.subr.bf16.mxu1 %v3891_v36 }
  0x50   : > { %3290 = vmatpush3.bf16.msra.mxu0 %v3910_v49 }
  0x51   : > { %3292 = vmatprep.subr.bf16.mxu0 %v3914_v52 }
  0x52   : > { %2679 = vmatmul.mubr.msk.f32.gmra.mrb[10].mxu0 %vm242_vm0, %v231_v27  ;;  %3274 = vmatpush3.bf16.msra.mxu1 %v3891_v36 }
  0x53   : > { %2681 = vmatprep.mubr.msk.f32.mxu0 %vm242_vm0, %v232_v30  ;;  %3276 = vmatprep.subr.bf16.mxu1 %v3899_v40 }
  0x54   : > { %3294 = vmatpush3.bf16.msra.mxu0 %v3914_v52 }
  0x55   : > { %3296 = vmatprep.subr.bf16.mxu0 %v3918_v55 }
  0x56   : > { %2682 = vmatmul.mubr.msk.f32.gmra.mrb[12].mxu0 %vm242_vm0, %v233_v32  ;;  %3278 = vmatpush3.bf16.msra.mxu1 %v3899_v40 }
  0x57   : > { %2684 = vmatprep.mubr.msk.f32.mxu0 %vm242_vm0, %v234_v35 }
  0x58   : > { %3298 = vmatpush3.bf16.msra.mxu0 %v3918_v55 }
  0x59   : > { %3300 = vmatprep.subr.bf16.mxu0 %v3922_v58 }
  0x5a   : > { %2685 = vmatmul.mubr.msk.f32.gmra.mrb[14].mxu0 %vm242_vm0, %v235_v37 }
  0x5c   : > { %3302 = vmatpush3.bf16.msra.mxu0 %v3922_v58 }
  0x5d   : > { %3304 = vmatprep.subr.bf16.mxu0 %v3926_v61 }
  0x60   : > { %3306 = vmatpush3.bf16.msra.mxu0 %v3926_v61 }
  0x61   : > { %3308 = vmatprep.subr.bf16.mxu0 %v3930_v0 }
  0x64   : > { %3310 = vmatpush3.bf16.msra.mxu0 %v3930_v0 }
  0x65   : > { %3344 = vmatprep.subr.bf16.mxu0 %v3848_v10 }
 0x111   : > { %v2665_v2 = vpop.f32.mrb[0].mxu0 }
 0x112   : > { %v3936_v3 = vadd.f32 %v2665_v2, %v2294_v1  ;;  %v357_v4 = vpop.f32.mrb[1].mxu0 }
 0x113   : > { %v3938_v5 = vadd.f32 %v2294_v1, %v357_v4 }
 0x114   : > { %v4607_v8 = vmax.f32 %v3936_v3, 0.0 }
 0x115   : > { %v4606_v6 = vmax.f32 %v3938_v5, 0.0  ;;  %v2668_v7 = vpop.f32.mrb[2].mxu0 }
 0x116   : > { %v3942_v9 = vadd.f32 %v2668_v7, %v2294_v1  ;;  %v367_v12 = vpop.f32.mrb[3].mxu0 }
 0x117   : > { %v3944_v13 = vadd.f32 %v2294_v1, %v367_v12  ;;  %2719 = vmatprep.mubr.f32.mxu1 %v4606_v6 }
 0x118   : > { %2720 = vmatmul.mubr.f32.vlgmr.msra.gmra.mrb[0].mxu1 %v4607_v8  ;;  %v4605_v17 = vmax.f32 %v3942_v9, 0.0 }
 0x119   : > { %v4604_v14 = vmax.f32 %v3944_v13, 0.0  ;;  %v2671_v15 = vpop.f32.mrb[4].mxu0 }
 0x11a   : > { %v3952_v18 = vadd.f32 %v2671_v15, %v2294_v1  ;;  %v377_v19 = vpop.f32.mrb[5].mxu0 }
 0x11b   : > { %v3954_v20 = vadd.f32 %v2294_v1, %v377_v19  ;;  %2722 = vmatprep.mubr.f32.mxu1 %v4604_v14 }
 0x11c   : > { %2723 = vmatmul.mubr.f32.gmra.mrb[2].mxu1 %v4605_v17  ;;  %v4603_v24 = vmax.f32 %v3952_v18, 0.0 }
 0x11d   : > { %v4602_v22 = vmax.f32 %v3954_v20, 0.0  ;;  %v2674_v23 = vpop.f32.mrb[6].mxu0 }
 0x11e   : > { %v3962_v25 = vadd.f32 %v2674_v23, %v2294_v1  ;;  %v387_v27 = vpop.f32.mrb[7].mxu0 }
 0x11f   : > { %v3964_v28 = vadd.f32 %v2294_v1, %v387_v27  ;;  %2725 = vmatprep.mubr.f32.mxu1 %v4602_v22 }
 0x120   : > { %2726 = vmatmul.mubr.f32.gmra.mrb[4].mxu1 %v4603_v24  ;;  %v4601_v32 = vmax.f32 %v3962_v25, 0.0 }
 0x121   : > { %v4600_v29 = vmax.f32 %v3964_v28, 0.0  ;;  %v2677_v30 = vpop.f32.mrb[8].mxu0 }
 0x122   : > { %v3972_v33 = vadd.f32 %v2677_v30, %v2294_v1  ;;  %v397_v34 = vpop.f32.mrb[9].mxu0 }
 0x123   : > { %v3974_v35 = vadd.f32 %v2294_v1, %v397_v34  ;;  %2728 = vmatprep.mubr.f32.mxu1 %v4600_v29 }
 0x124   : > { %2729 = vmatmul.mubr.f32.gmra.mrb[6].mxu1 %v4601_v32  ;;  %v4599_v39 = vmax.f32 %v3972_v33, 0.0 }
 0x125   : > { %v4598_v37 = vmax.f32 %v3974_v35, 0.0  ;;  %v2680_v38 = vpop.f32.mrb[10].mxu0 }
 0x126   : > { %v3982_v41 = vadd.f32 %v2680_v38, %v2294_v1  ;;  %v407_v42 = vpop.f32.mrb[11].mxu0 }
 0x127   : > { %v3984_v43 = vadd.f32 %v2294_v1, %v407_v42  ;;  %2731 = vmatprep.mubr.f32.mxu1 %v4598_v37 }
 0x128   : > { %2732 = vmatmul.mubr.f32.gmra.mrb[8].mxu1 %v4599_v39  ;;  %v4597_v48 = vmax.f32 %v3982_v41, 0.0 }
 0x129   : > { %v4596_v45 = vmax.f32 %v3984_v43, 0.0  ;;  %v2683_v47 = vpop.f32.mrb[12].mxu0 }
 0x12a   : > { %v3992_v50 = vadd.f32 %v2683_v47, %v2294_v1  ;;  %v417_v51 = vpop.f32.mrb[13].mxu0 }
 0x12b   : > { %v3994_v53 = vadd.f32 %v2294_v1, %v417_v51  ;;  %2734 = vmatprep.mubr.f32.mxu1 %v4596_v45 }
 0x12c   : > { %2735 = vmatmul.mubr.f32.gmra.mrb[10].mxu1 %v4597_v48  ;;  %v4595_v57 = vmax.f32 %v3992_v50, 0.0 }
 0x12d   : > { %v4594_v54 = vmax.f32 %v3994_v53, 0.0  ;;  %v2686_v56 = vpop.f32.mrb[14].mxu0 }
 0x12e   : > { %v4002_v59 = vadd.f32 %v2686_v56, %v2294_v1  ;;  %v427_v60 = vpop.f32.mrb[15].mxu0 }
 0x12f   : > { %v4004_v62 = vadd.f32 %v2294_v1, %v427_v60  ;;  %2737 = vmatprep.mubr.f32.mxu1 %v4594_v54  ;;  %v4024_v1 = vld [vmem:[%s4021_s29] sm:$0xff] }
 0x130   : > { %2738 = vmatmul.mubr.f32.gmra.mrb[12].mxu1 %v4595_v57  ;;  %v4593_v2 = vmax.f32 %v4002_v59, 0.0 }
 0x131   : > { %v4592_v63 = vmax.f32 %v4004_v62, 0.0 }
 0x133   : > { %2740 = vmatprep.mubr.f32.mxu1 %v4592_v63 }
 0x134   : > { %2741 = vmatmul.mubr.f32.gmra.mrb[14].mxu1 %v4593_v2 }
 0x135   : > { %2831 = vmatprep.mubr.f32.mxu1 %v4024_v1 }
 0x1eb   : > { %v2721_v4 = vpop.f32.mrb[0].mxu1 }
 0x1ec   : > { %v555_v7 = vpop.f32.mrb[1].mxu1 }
 0x1ed   : > { %v3311_v12 = vpack.c.bf16 %v2721_v4, %v555_v7  ;;  %2775 = vmatprep.mubr.f32.mxu0 %v555_v7 }
 0x1ee   : > { %2776 = vmatmul.mubr.f32.vlgmr.msra.gmra.mrb[16].mxu0 %v2721_v4 }
 0x1ef   : > { %v2724_v15 = vpop.f32.mrb[2].mxu1  ;;  %3312 = vmatprep.subr.bf16.mxu1 %v3311_v12  ;;  %3346 = vmatpush3.bf16.msra.mxu0 %v3848_v10 }
 0x1f0   : > { %v565_v19 = vpop.f32.mrb[3].mxu1  ;;  %3314 = vmatpush3.bf16.msra.mxu1 %v3311_v12  ;;  %3348 = vmatprep.subr.bf16.mxu0 %v3850_v11 }
 0x1f1   : > { %v3315_v23 = vpack.c.bf16 %v2724_v15, %v565_v19  ;;  %2778 = vmatprep.mubr.f32.mxu0 %v565_v19 }
 0x1f2   : > { %2779 = vmatmul.mubr.f32.gmra.mrb[18].mxu0 %v2724_v15 }
 0x1f3   : > { %v2727_v27 = vpop.f32.mrb[4].mxu1  ;;  %3316 = vmatprep.subr.bf16.mxu1 %v3315_v23  ;;  %3350 = vmatpush3.bf16.msra.mxu0 %v3850_v11 }
 0x1f4   : > { %v575_v30 = vpop.f32.mrb[5].mxu1  ;;  %3318 = vmatpush3.bf16.msra.mxu1 %v3315_v23  ;;  %3352 = vmatprep.subr.bf16.mxu0 %v3859_v16 }
 0x1f5   : > { %v3319_v34 = vpack.c.bf16 %v2727_v27, %v575_v30  ;;  %2781 = vmatprep.mubr.f32.mxu0 %v575_v30 }
 0x1f6   : > { %2782 = vmatmul.mubr.f32.gmra.mrb[20].mxu0 %v2727_v27 }
 0x1f7   : > { %v2730_v38 = vpop.f32.mrb[6].mxu1  ;;  %3320 = vmatprep.subr.bf16.mxu1 %v3319_v34  ;;  %3354 = vmatpush3.bf16.msra.mxu0 %v3859_v16 }
 0x1f8   : > { %v585_v42 = vpop.f32.mrb[7].mxu1  ;;  %3322 = vmatpush3.bf16.msra.mxu1 %v3319_v34  ;;  %3356 = vmatprep.subr.bf16.mxu0 %v3867_v21 }
 0x1f9   : > { %v3323_v47 = vpack.c.bf16 %v2730_v38, %v585_v42  ;;  %2784 = vmatprep.mubr.f32.mxu0 %v585_v42  ;;  %v4046_v42 = vld [vmem:[%s4021_s29 + $0x10] sm:$0xff] }
 0x1fa   : > { %2785 = vmatmul.mubr.f32.gmra.mrb[22].mxu0 %v2730_v38  ;;  %v4043_v38 = vld [vmem:[%s4021_s29 + $0x8] sm:$0xff] }
 0x1fb   : > { %v2733_v51 = vpop.f32.mrb[8].mxu1  ;;  %3324 = vmatprep.subr.bf16.mxu1 %v3323_v47  ;;  %3358 = vmatpush3.bf16.msra.mxu0 %v3867_v21 }
 0x1fc   : > { %v595_v56 = vpop.f32.mrb[9].mxu1  ;;  %3326 = vmatpush3.bf16.msra.mxu1 %v3323_v47  ;;  %3360 = vmatprep.subr.bf16.mxu0 %v3875_v26  ;;  %v4052_v47 = vld [vmem:[%s4021_s29 + $0x18] sm:$0xff] }
 0x1fd   : > { %v3327_v60 = vpack.c.bf16 %v2733_v51, %v595_v56  ;;  %2787 = vmatprep.mubr.f32.mxu0 %v595_v56  ;;  %v4062_v56 = vld [vmem:[%s4021_s29 + $0x28] sm:$0xff] }
 0x1fe   : > { %2788 = vmatmul.mubr.f32.gmra.mrb[24].mxu0 %v2733_v51  ;;  %v4056_v51 = vld [vmem:[%s4021_s29 + $0x20] sm:$0xff]  ;;  %4658 = vst [vmem:[#allocation15_spill] sm:$0xff] %v4062_v56 }
 0x1ff   : > { %v2736_v4 = vpop.f32.mrb[10].mxu1  ;;  %3328 = vmatprep.subr.bf16.mxu1 %v3327_v60  ;;  %3362 = vmatpush3.bf16.msra.mxu0 %v3875_v26  ;;  %4657 = vst [vmem:[#allocation14_spill] sm:$0xff] %v4056_v51 }
 0x200   : > { %v605_v7 = vpop.f32.mrb[11].mxu1  ;;  %3330 = vmatpush3.bf16.msra.mxu1 %v3327_v60  ;;  %3364 = vmatprep.subr.bf16.mxu0 %v3883_v31  ;;  %v4066_v60 = vld [vmem:[%s4021_s29 + $0x30] sm:$0xff] }
 0x201   : > { %v3331_v12 = vpack.c.bf16 %v2736_v4, %v605_v7  ;;  %2790 = vmatprep.mubr.f32.mxu0 %v605_v7  ;;  %4659 = vst [vmem:[#allocation16_spill] sm:$0xff] %v4066_v60  ;;  %v4076_v7 = vld [vmem:[%s4021_s29 + $0x40] sm:$0xff] }
 0x202   : > { %2791 = vmatmul.mubr.f32.gmra.mrb[26].mxu0 %v2736_v4  ;;  %v4072_v4 = vld [vmem:[%s4021_s29 + $0x38] sm:$0xff]  ;;  %4661 = vst [vmem:[#allocation18_spill] sm:$0xff] %v4076_v7 }
 0x203   : > { %v2739_v15 = vpop.f32.mrb[12].mxu1  ;;  %3332 = vmatprep.subr.bf16.mxu1 %v3331_v12  ;;  %3366 = vmatpush3.bf16.msra.mxu0 %v3883_v31  ;;  %4660 = vst [vmem:[#allocation17_spill] sm:$0xff] %v4072_v4 }
 0x204   : > { %v615_v19 = vpop.f32.mrb[13].mxu1  ;;  %3334 = vmatpush3.bf16.msra.mxu1 %v3331_v12  ;;  %3368 = vmatprep.subr.bf16.mxu0 %v3891_v36  ;;  %v4082_v12 = vld [vmem:[%s4021_s29 + $0x48] sm:$0xff] }
 0x205   : > { %v3335_v23 = vpack.c.bf16 %v2739_v15, %v615_v19  ;;  %2793 = vmatprep.mubr.f32.mxu0 %v615_v19  ;;  %4662 = vst [vmem:[#allocation19_spill] sm:$0xff] %v4082_v12  ;;  %v4092_v19 = vld [vmem:[%s4021_s29 + $0x58] sm:$0xff] }
 0x206   : > { %2794 = vmatmul.mubr.f32.gmra.mrb[28].mxu0 %v2739_v15  ;;  %v4086_v15 = vld [vmem:[%s4021_s29 + $0x50] sm:$0xff]  ;;  %4664 = vst [vmem:[#allocation21_spill] sm:$0xff] %v4092_v19 }
 0x207   : > { %v2742_v27 = vpop.f32.mrb[14].mxu1  ;;  %3336 = vmatprep.subr.bf16.mxu1 %v3335_v23  ;;  %3370 = vmatpush3.bf16.msra.mxu0 %v3891_v36  ;;  %4663 = vst [vmem:[#allocation20_spill] sm:$0xff] %v4086_v15 }
 0x208   : > { %v625_v30 = vpop.f32.mrb[15].mxu1  ;;  %3338 = vmatpush3.bf16.msra.mxu1 %v3335_v23  ;;  %3372 = vmatprep.subr.bf16.mxu0 %v3899_v40  ;;  %v4096_v23 = vld [vmem:[%s4021_s29 + $0x60] sm:$0xff] }
 0x209   : > { %v3339_v34 = vpack.c.bf16 %v2742_v27, %v625_v30  ;;  %2796 = vmatprep.mubr.f32.mxu0 %v625_v30  ;;  %4665 = vst [vmem:[#allocation22_spill] sm:$0xff] %v4096_v23  ;;  %v4106_v30 = vld [vmem:[%s4021_s29 + $0x70] sm:$0xff] }
 0x20a   : > { %2797 = vmatmul.mubr.f32.gmra.mrb[30].mxu0 %v2742_v27  ;;  %v4102_v27 = vld [vmem:[%s4021_s29 + $0x68] sm:$0xff]  ;;  %4667 = vst [vmem:[#allocation24_spill] sm:$0xff] %v4106_v30 }
 0x20b   : > { %3340 = vmatprep.subr.bf16.mxu1 %v3339_v34  ;;  %3374 = vmatpush3.bf16.msra.mxu0 %v3899_v40  ;;  %4666 = vst [vmem:[#allocation23_spill] sm:$0xff] %v4102_v27 }
 0x20c   : > { %3342 = vmatpush3.bf16.msra.mxu1 %v3339_v34  ;;  %v4112_v34 = vld [vmem:[%s4021_s29 + $0x78] sm:$0xff] }
 0x20d   : > { %3376 = vmatprep.subr.bf16.mxu1 %v3903_v44  ;;  %4668 = vst [vmem:[#allocation25_spill] sm:$0xff] %v4112_v34 }
 0x20f   : > { %2832 = vmatmul.mubr.f32.vlgmr.msra.gmra.mrb[16].mxu1 %v4043_v38 }
 0x210   : > { %2834 = vmatprep.mubr.f32.mxu1 %v4046_v42  ;;  %3378 = vmatpush3.bf16.msra.mxu1 %v3903_v44 }
 0x211   : > { %3380 = vmatprep.subr.bf16.mxu1 %v3905_v46 }
 0x213   : > { %2835 = vmatmul.mubr.f32.gmra.mrb[18].mxu1 %v4052_v47 }
 0x214   : > { %2837 = vmatprep.mubr.f32.mxu1 %v4056_v51  ;;  %3382 = vmatpush3.bf16.msra.mxu1 %v3905_v46 }
 0x215   : > { %3384 = vmatprep.subr.bf16.mxu1 %v3910_v49 }
 0x217   : > { %2838 = vmatmul.mubr.f32.gmra.mrb[20].mxu1 %v4062_v56 }
 0x218   : > { %2840 = vmatprep.mubr.f32.mxu1 %v4066_v60  ;;  %3386 = vmatpush3.bf16.msra.mxu1 %v3910_v49  ;;  %v4670_v60 = vmax.f32 %v3938_v5, 0.0 }
 0x219   : > { %3388 = vmatprep.subr.bf16.mxu1 %v3914_v52 }
 0x21b   : > { %2841 = vmatmul.mubr.f32.gmra.mrb[22].mxu1 %v4072_v4 }
 0x21c   : > { %2843 = vmatprep.mubr.f32.mxu1 %v4076_v7  ;;  %3390 = vmatpush3.bf16.msra.mxu1 %v3914_v52 }
 0x21d   : > { %3392 = vmatprep.subr.bf16.mxu1 %v3918_v55 }
 0x21f   : > { %2844 = vmatmul.mubr.f32.gmra.mrb[24].mxu1 %v4082_v12  ;;  %v4669_v12 = vmax.f32 %v3936_v3, 0.0  ;;  %v4671_v3 = vmax.f32 %v3942_v9, 0.0 }
 0x220   : > { %2846 = vmatprep.mubr.f32.mxu1 %v4086_v15  ;;  %3394 = vmatpush3.bf16.msra.mxu1 %v3918_v55 }
 0x221   : > { %3396 = vmatprep.subr.bf16.mxu1 %v3922_v58 }
 0x223   : > { %2847 = vmatmul.mubr.f32.gmra.mrb[26].mxu1 %v4092_v19 }
 0x224   : > { %2849 = vmatprep.mubr.f32.mxu1 %v4096_v23  ;;  %3398 = vmatpush3.bf16.msra.mxu1 %v3922_v58 }
 0x225   : > { %3400 = vmatprep.subr.bf16.mxu1 %v3926_v61 }
 0x227   : > { %2850 = vmatmul.mubr.f32.gmra.mrb[28].mxu1 %v4102_v27 }
 0x228   : > { %2852 = vmatprep.mubr.f32.mxu1 %v4106_v30  ;;  %3402 = vmatpush3.bf16.msra.mxu1 %v3926_v61  ;;  %v4140_v61 = vld [vmem:[#allocation2 + $0xa] ss:$0 sm:$0xff] }
 0x229   : > { %3404 = vmatprep.subr.bf16.mxu1 %v3930_v0  ;;  %v962_v55 = vmul.f32 %v4140_v61, %v4669_v12  ;;  %v964_v12 = vmul.f32 %v4140_v61, %v4671_v3 }
 0x22b   : > { %2853 = vmatmul.mubr.f32.gmra.mrb[30].mxu1 %v4112_v34  ;;  %v4137_v34 = vld [vmem:[#allocation2 + $0x9] ss:$0 sm:$0xff] }
 0x22c   : > { %3406 = vmatpush3.bf16.msra.mxu1 %v3930_v0 }
 0x22d   : > { %3440 = vmatprep.subr.bf16.mxu1 %v3848_v10 }
 0x2c1   : > { %v2777_v63 = vpop.f32.mrb[16].mxu0 }
 0x2c2   : > { %v700_v2 = vpop.f32.mrb[17].mxu0 }
 0x2c5   : > { %v2780_v54 = vpop.f32.mrb[18].mxu0 }
 0x2c6   : > { %v710_v57 = vpop.f32.mrb[19].mxu0 }
 0x2c9   : > { %v2783_v45 = vpop.f32.mrb[20].mxu0 }
 0x2ca   : > { %v720_v48 = vpop.f32.mrb[21].mxu0 }
 0x2cd   : > { %v2786_v37 = vpop.f32.mrb[22].mxu0 }
 0x2ce   : > { %v4119_v39 = vpop.f32.mrb[23].mxu0 }
 0x2d1   : > { %v4121_v29 = vpop.f32.mrb[24].mxu0 }
 0x2d2   : > { %v4123_v32 = vpop.f32.mrb[25].mxu0 }
 0x2d5   : > { %v4125_v22 = vpop.f32.mrb[26].mxu0 }
 0x2d6   : > { %v4127_v24 = vpop.f32.mrb[27].mxu0 }
 0x2d9   : > { %v4129_v14 = vpop.f32.mrb[28].mxu0 }
 0x2da   : > { %v4131_v17 = vpop.f32.mrb[29].mxu0 }
 0x2dd   : > { %v4133_v6 = vpop.f32.mrb[30].mxu0 }
 0x2de   : > { %v4135_v8 = vpop.f32.mrb[31].mxu0 }
 0x2e2   : > { %v2833_v0 = vpop.f32.mrb[16].mxu1 }
 0x2e3   : > { %v851_v30 = vadd.f32 %v2833_v0, %v4137_v34  ;;  %v845_v27 = vpop.f32.mrb[17].mxu1  ;;  %v961_v0 = vmul.f32 %v4140_v61, %v4670_v60  ;;  %v4672_v60 = vmax.f32 %v3944_v13, 0.0 }
 0x2e4   : > { %v846_v23 = vadd.f32 %v4137_v34, %v845_v27 }
 0x2e5   : > { %v925_v19 = vsub.f32 %v851_v30, %v2777_v63 }
 0x2e6   : > { %v924_v58 = vsub.f32 %v846_v23, %v700_v2  ;;  %v2836_v15 = vpop.f32.mrb[18].mxu1 }
 0x2e7   : > { %v941_v7 = vmax.f32 %v925_v19, 0.0  ;;  %v861_v4 = vadd.f32 %v2836_v15, %v4137_v34  ;;  %v855_v52 = vpop.f32.mrb[19].mxu1 }
 0x2e8   : > { %v940_v56 = vmax.f32 %v924_v58, 0.0  ;;  %v856_v49 = vadd.f32 %v4137_v34, %v855_v52  ;;  %v963_v58 = vmul.f32 %v4140_v61, %v4672_v60 }
 0x2e9   : > { %v4151_v51 = vadd.f32 %v962_v55, %v941_v7  ;;  %v927_v63 = vsub.f32 %v861_v4, %v2780_v54  ;;  %v4673_v4 = vmax.f32 %v3952_v18, 0.0 }
 0x2ea   : > { %v926_v2 = vsub.f32 %v856_v49, %v710_v57  ;;  %v2839_v23 = vpop.f32.mrb[20].mxu1  ;;  %v4153_v27 = vadd.f32 %v961_v0, %v940_v56 }
 0x2eb   : > { %v943_v15 = vmax.f32 %v927_v63, 0.0  ;;  %v871_v19 = vadd.f32 %v2839_v23, %v4137_v34  ;;  %v865_v5 = vpop.f32.mrb[21].mxu1  ;;  %v966_v13 = vmul.f32 %v4140_v61, %v4673_v4  ;;  %v4674_v63 = vmax.f32 %v3954_v20, 0.0 }
 0x2ec   : > { %v942_v52 = vmax.f32 %v926_v2, 0.0  ;;  %v866_v55 = vadd.f32 %v4137_v34, %v865_v5  ;;  %2887 = vmatprep.mubr.f32.mxu0 %v4153_v27 }
 0x2ed   : > { %v929_v49 = vsub.f32 %v871_v19, %v2783_v45  ;;  %2888 = vmatmul.mubr.f32.vlgmr.msra.gmra.mrb[32].mxu0 %v4151_v51  ;;  %v4165_v54 = vadd.f32 %v964_v12, %v943_v15  ;;  %v965_v45 = vmul.f32 %v4140_v61, %v4674_v63  ;;  %v4675_v19 = vmax.f32 %v3962_v25, 0.0 }
 0x2ee   : > { %v928_v9 = vsub.f32 %v866_v55, %v720_v48  ;;  %v2842_v57 = vpop.f32.mrb[22].mxu1  ;;  %v4167_v56 = vadd.f32 %v963_v58, %v942_v52  ;;  %v4676_v52 = vmax.f32 %v3964_v28, 0.0  ;;  %v4677_v28 = vmax.f32 %v3972_v33, 0.0 }
 0x2ef   : > { %v945_v7 = vmax.f32 %v929_v49, 0.0  ;;  %v881_v30 = vadd.f32 %v2842_v57, %v4137_v34  ;;  %v875_v0 = vpop.f32.mrb[23].mxu1  ;;  %v968_v20 = vmul.f32 %v4140_v61, %v4675_v19  ;;  %v4678_v63 = vmax.f32 %v3974_v35, 0.0 }
 0x2f0   : > { %v944_v2 = vmax.f32 %v928_v9, 0.0  ;;  %v876_v23 = vadd.f32 %v4137_v34, %v875_v0  ;;  %2890 = vmatprep.mubr.f32.mxu0 %v4167_v56  ;;  %v4679_v35 = vmax.f32 %v3982_v41, 0.0 }
 0x2f1   : > { %v931_v48 = vsub.f32 %v881_v30, %v2786_v37  ;;  %2891 = vmatmul.mubr.f32.gmra.mrb[34].mxu0 %v4165_v54  ;;  %v4179_v3 = vadd.f32 %v966_v13, %v945_v7  ;;  %v967_v37 = vmul.f32 %v4140_v61, %v4676_v52  ;;  %v970_v13 = vmul.f32 %v4140_v61, %v4677_v28 }
 0x2f2   : > { %v930_v18 = vsub.f32 %v876_v23, %v4119_v39  ;;  %v2845_v12 = vpop.f32.mrb[24].mxu1  ;;  %v4182_v15 = vadd.f32 %v965_v45, %v944_v2 }
 0x2f3   : > { %v947_v5 = vmax.f32 %v931_v48, 0.0  ;;  %v891_v60 = vadd.f32 %v2845_v12, %v4137_v34  ;;  %v885_v58 = vpop.f32.mrb[25].mxu1  ;;  %v972_v12 = vmul.f32 %v4140_v61, %v4679_v35 }
 0x2f4   : > { %v946_v55 = vmax.f32 %v930_v18, 0.0  ;;  %v886_v49 = vadd.f32 %v4137_v34, %v885_v58  ;;  %2893 = vmatprep.mubr.f32.mxu0 %v4182_v15 }
 0x2f5   : > { %v933_v39 = vsub.f32 %v891_v60, %v4121_v29  ;;  %2894 = vmatmul.mubr.f32.gmra.mrb[36].mxu0 %v4179_v3  ;;  %v4195_v25 = vadd.f32 %v968_v20, %v947_v5  ;;  %v969_v29 = vmul.f32 %v4140_v61, %v4678_v63  ;;  %v4680_v60 = vmax.f32 %v3984_v43, 0.0 }
 0x2f6   : > { %v932_v9 = vsub.f32 %v886_v49, %v4123_v32  ;;  %v2848_v57 = vpop.f32.mrb[26].mxu1  ;;  %v4198_v4 = vadd.f32 %v967_v37, %v946_v55  ;;  %v4681_v43 = vmax.f32 %v3992_v50, 0.0 }
 0x2f7   : > { %v949_v7 = vmax.f32 %v933_v39, 0.0  ;;  %v901_v30 = vadd.f32 %v2848_v57, %v4137_v34  ;;  %v895_v0 = vpop.f32.mrb[27].mxu1 }
 0x2f8   : > { %v948_v45 = vmax.f32 %v932_v9, 0.0  ;;  %v896_v2 = vadd.f32 %v4137_v34, %v895_v0  ;;  %2896 = vmatprep.mubr.f32.mxu0 %v4198_v4  ;;  %v974_v39 = vmul.f32 %v4140_v61, %v4681_v43 }
 0x2f9   : > { %v935_v32 = vsub.f32 %v901_v30, %v4125_v22  ;;  %2897 = vmatmul.mubr.f32.gmra.mrb[38].mxu0 %v4195_v25  ;;  %v4211_v33 = vadd.f32 %v970_v13, %v949_v7  ;;  %v971_v22 = vmul.f32 %v4140_v61, %v4680_v60  ;;  %v4682_v13 = vmax.f32 %v3994_v53, 0.0 }
 0x2fa   : > { %v934_v23 = vsub.f32 %v896_v2, %v4127_v24  ;;  %v2851_v48 = vpop.f32.mrb[28].mxu1  ;;  %v4214_v18 = vadd.f32 %v969_v29, %v948_v45  ;;  %v4683_v29 = vmax.f32 %v4002_v59, 0.0  ;;  %v4684_v2 = vmax.f32 %v4004_v62, 0.0 }
 0x2fb   : > { %v951_v19 = vmax.f32 %v935_v32, 0.0  ;;  %v911_v20 = vadd.f32 %v2851_v48, %v4137_v34  ;;  %v905_v5 = vpop.f32.mrb[29].mxu1 }
 0x2fc   : > { %v950_v58 = vmax.f32 %v934_v23, 0.0  ;;  %v906_v52 = vadd.f32 %v4137_v34, %v905_v5  ;;  %2899 = vmatprep.mubr.f32.mxu0 %v4214_v18  ;;  %v976_v53 = vmul.f32 %v4140_v61, %v4683_v29  ;;  %v975_v32 = vmul.f32 %v4140_v61, %v4684_v2  ;;  %v4698_v29 = vld [vmem:[#allocation12_spill] sm:$0xff]  ;;  %v4701_v2 = vld [vmem:[#allocation13_spill] sm:$0xff] }
 0x2fd   : > { %v937_v24 = vsub.f32 %v911_v20, %v4129_v14  ;;  %2900 = vmatmul.mubr.f32.gmra.mrb[40].mxu0 %v4211_v33  ;;  %v4227_v41 = vadd.f32 %v972_v12, %v951_v19  ;;  %v973_v14 = vmul.f32 %v4140_v61, %v4682_v13  ;;  %v4690_v13 = vld [vmem:[#allocation17_spill] sm:$0xff] }
 0x2fe   : > { %v936_v37 = vsub.f32 %v906_v52, %v4131_v17  ;;  %v2854_v55 = vpop.f32.mrb[30].mxu1  ;;  %v4230_v49 = vadd.f32 %v971_v22, %v950_v58 }
 0x2ff   : > { %v953_v9 = vmax.f32 %v937_v24, 0.0  ;;  %v921_v57 = vadd.f32 %v2854_v55, %v4137_v34  ;;  %v915_v28 = vpop.f32.mrb[31].mxu1 }
 0x300   : > { %v952_v7 = vmax.f32 %v936_v37, 0.0  ;;  %v916_v30 = vadd.f32 %v4137_v34, %v915_v28  ;;  %2902 = vmatprep.mubr.f32.mxu0 %v4230_v49  ;;  %v4689_v28 = vld [vmem:[#allocation9_spill] sm:$0xff] }
 0x301   : > { %v939_v17 = vsub.f32 %v921_v57, %v4133_v6  ;;  %2903 = vmatmul.mubr.f32.gmra.mrb[42].mxu0 %v4227_v41  ;;  %v4243_v50 = vadd.f32 %v974_v39, %v953_v9  ;;  %v4688_v57 = vld [vmem:[#allocation16_spill] sm:$0xff] }
 0x302   : > { %v938_v0 = vsub.f32 %v916_v30, %v4135_v8  ;;  %v4246_v63 = vadd.f32 %v973_v14, %v952_v7  ;;  %v4692_v14 = vld [vmem:[#allocation10_spill] sm:$0xff]  ;;  %v4693_v7 = vld [vmem:[#allocation19_spill] sm:$0xff] }
 0x303   : > { %v955_v45 = vmax.f32 %v939_v17, 0.0  ;;  %v4695_v30 = vld [vmem:[#allocation11_spill] sm:$0xff]  ;;  %v4696_v17 = vld [vmem:[#allocation21_spill] sm:$0xff] }
 0x304   : > { %v954_v23 = vmax.f32 %v938_v0, 0.0  ;;  %2905 = vmatprep.mubr.f32.mxu0 %v4246_v63  ;;  %v4697_v0 = vld [vmem:[#allocation22_spill] sm:$0xff] }
 0x305   : > { %2906 = vmatmul.mubr.f32.gmra.mrb[44].mxu0 %v4243_v50  ;;  %v4256_v6 = vadd.f32 %v976_v53, %v955_v45  ;;  %v4699_v53 = vld [vmem:[#allocation23_spill] sm:$0xff]  ;;  %v4700_v45 = vld [vmem:[#allocation24_spill] sm:$0xff] }
 0x306   : > { %v4258_v48 = vadd.f32 %v975_v32, %v954_v23  ;;  %v4702_v32 = vld [vmem:[#allocation25_spill] sm:$0xff] }
 0x308   : > { %2908 = vmatprep.mubr.f32.mxu0 %v4258_v48 }
 0x309   : > { %2909 = vmatmul.mubr.f32.gmra.mrb[46].mxu0 %v4256_v6 }
 0x30a   : > { %2999 = vmatprep.mubr.f32.mxu0 %v4024_v1 }
 0x3c0   : > { %v2889_v8 = vpop.f32.mrb[32].mxu0 }
 0x3c1   : > { %v1059_v59 = vpop.f32.mrb[33].mxu0 }
 0x3c2   : > { %v3407_v62 = vpack.c.bf16 %v2889_v8, %v1059_v59  ;;  %2943 = vmatprep.mubr.f32.mxu1 %v1059_v59 }
 0x3c3   : > { %2944 = vmatmul.mubr.f32.vlgmr.msra.gmra.mrb[32].mxu1 %v2889_v8 }
 0x3c4   : > { %v2892_v61 = vpop.f32.mrb[34].mxu0  ;;  %3408 = vmatprep.subr.bf16.mxu0 %v3407_v62  ;;  %3442 = vmatpush3.bf16.msra.mxu1 %v3848_v10 }
 0x3c5   : > { %v1069_v35 = vpop.f32.mrb[35].mxu0  ;;  %3410 = vmatpush3.bf16.msra.mxu0 %v3407_v62  ;;  %3444 = vmatprep.subr.bf16.mxu1 %v3850_v11 }
 0x3c6   : > { %v3411_v12 = vpack.c.bf16 %v2892_v61, %v1069_v35  ;;  %2946 = vmatprep.mubr.f32.mxu1 %v1069_v35 }
 0x3c7   : > { %2947 = vmatmul.mubr.f32.gmra.mrb[34].mxu1 %v2892_v61 }
 0x3c8   : > { %v2895_v19 = vpop.f32.mrb[36].mxu0  ;;  %3412 = vmatprep.subr.bf16.mxu0 %v3411_v12  ;;  %3446 = vmatpush3.bf16.msra.mxu1 %v3850_v11 }
 0x3c9   : > { %v1079_v20 = vpop.f32.mrb[37].mxu0  ;;  %3414 = vmatpush3.bf16.msra.mxu0 %v3411_v12  ;;  %3448 = vmatprep.subr.bf16.mxu1 %v3859_v16 }
 0x3ca   : > { %v3415_v5 = vpack.c.bf16 %v2895_v19, %v1079_v20  ;;  %2949 = vmatprep.mubr.f32.mxu1 %v1079_v20 }
 0x3cb   : > { %2950 = vmatmul.mubr.f32.gmra.mrb[36].mxu1 %v2895_v19 }
 0x3cc   : > { %v2898_v60 = vpop.f32.mrb[38].mxu0  ;;  %3416 = vmatprep.subr.bf16.mxu0 %v3415_v5  ;;  %3450 = vmatpush3.bf16.msra.mxu1 %v3859_v16 }
 0x3cd   : > { %v1089_v10 = vpop.f32.mrb[39].mxu0  ;;  %3418 = vmatpush3.bf16.msra.mxu0 %v3415_v5  ;;  %3452 = vmatprep.subr.bf16.mxu1 %v3867_v21 }
 0x3ce   : > { %v3419_v22 = vpack.c.bf16 %v2898_v60, %v1089_v10  ;;  %2952 = vmatprep.mubr.f32.mxu1 %v1089_v10 }
 0x3cf   : > { %2953 = vmatmul.mubr.f32.gmra.mrb[38].mxu1 %v2898_v60 }
 0x3d0   : > { %v2901_v58 = vpop.f32.mrb[40].mxu0  ;;  %3420 = vmatprep.subr.bf16.mxu0 %v3419_v22  ;;  %3454 = vmatpush3.bf16.msra.mxu1 %v3867_v21 }
 0x3d1   : > { %v1099_v11 = vpop.f32.mrb[41].mxu0  ;;  %3422 = vmatpush3.bf16.msra.mxu0 %v3419_v22  ;;  %3456 = vmatprep.subr.bf16.mxu1 %v3875_v26 }
 0x3d2   : > { %v3423_v52 = vpack.c.bf16 %v2901_v58, %v1099_v11  ;;  %2955 = vmatprep.mubr.f32.mxu1 %v1099_v11 }
 0x3d3   : > { %2956 = vmatmul.mubr.f32.gmra.mrb[40].mxu1 %v2901_v58 }
 0x3d4   : > { %v2904_v24 = vpop.f32.mrb[42].mxu0  ;;  %3424 = vmatprep.subr.bf16.mxu0 %v3423_v52  ;;  %3458 = vmatpush3.bf16.msra.mxu1 %v3875_v26 }
 0x3d5   : > { %v1109_v16 = vpop.f32.mrb[43].mxu0  ;;  %3426 = vmatpush3.bf16.msra.mxu0 %v3423_v52  ;;  %3460 = vmatprep.subr.bf16.mxu1 %v3883_v31 }
 0x3d6   : > { %v3427_v37 = vpack.c.bf16 %v2904_v24, %v1109_v16  ;;  %2958 = vmatprep.mubr.f32.mxu1 %v1109_v16 }
 0x3d7   : > { %2959 = vmatmul.mubr.f32.gmra.mrb[42].mxu1 %v2904_v24 }
 0x3d8   : > { %v2907_v55 = vpop.f32.mrb[44].mxu0  ;;  %3428 = vmatprep.subr.bf16.mxu0 %v3427_v37  ;;  %3462 = vmatpush3.bf16.msra.mxu1 %v3883_v31  ;;  %v4685_v31 = vld [vmem:[#allocation14_spill] sm:$0xff] }
 0x3d9   : > { %v1119_v21 = vpop.f32.mrb[45].mxu0  ;;  %3430 = vmatpush3.bf16.msra.mxu0 %v3427_v37  ;;  %3464 = vmatprep.subr.bf16.mxu1 %v3891_v36 }
 0x3da   : > { %v3431_v43 = vpack.c.bf16 %v2907_v55, %v1119_v21  ;;  %2961 = vmatprep.mubr.f32.mxu1 %v1119_v21 }
 0x3db   : > { %2962 = vmatmul.mubr.f32.gmra.mrb[44].mxu1 %v2907_v55  ;;  %v4326_v55 = vld [vmem:[#allocation2 + $0xb] ss:$0 sm:$0xff] }
 0x3dc   : > { %v2910_v39 = vpop.f32.mrb[46].mxu0  ;;  %3432 = vmatprep.subr.bf16.mxu0 %v3431_v43  ;;  %3466 = vmatpush3.bf16.msra.mxu1 %v3891_v36  ;;  %v4686_v36 = vld [vmem:[#allocation8_spill] sm:$0xff] }
 0x3dd   : > { %v1129_v26 = vpop.f32.mrb[47].mxu0  ;;  %3434 = vmatpush3.bf16.msra.mxu0 %v3431_v43  ;;  %3468 = vmatprep.subr.bf16.mxu1 %v3899_v40 }
 0x3de   : > { %v3435_v9 = vpack.c.bf16 %v2910_v39, %v1129_v26  ;;  %2964 = vmatprep.mubr.f32.mxu1 %v1129_v26 }
 0x3df   : > { %2965 = vmatmul.mubr.f32.gmra.mrb[46].mxu1 %v2910_v39 }
 0x3e0   : > { %3436 = vmatprep.subr.bf16.mxu0 %v3435_v9  ;;  %3470 = vmatpush3.bf16.msra.mxu1 %v3899_v40  ;;  %v4687_v40 = vld [vmem:[#allocation15_spill] sm:$0xff] }
 0x3e1   : > { %3438 = vmatpush3.bf16.msra.mxu0 %v3435_v9 }
 0x3e2   : > { %3472 = vmatprep.subr.bf16.mxu0 %v3903_v44 }
 0x3e4   : > { %3000 = vmatmul.mubr.f32.vlgmr.msra.gmra.mrb[48].mxu0 %v4043_v38 }
 0x3e5   : > { %3002 = vmatprep.mubr.f32.mxu0 %v4046_v42  ;;  %3474 = vmatpush3.bf16.msra.mxu0 %v3903_v44  ;;  %v4691_v44 = vld [vmem:[#allocation18_spill] sm:$0xff] }
 0x3e6   : > { %3476 = vmatprep.subr.bf16.mxu0 %v3905_v46 }
 0x3e8   : > { %3003 = vmatmul.mubr.f32.gmra.mrb[50].mxu0 %v4052_v47 }
 0x3e9   : > { %3005 = vmatprep.mubr.f32.mxu0 %v4685_v31  ;;  %3478 = vmatpush3.bf16.msra.mxu0 %v3905_v46  ;;  %v4694_v46 = vld [vmem:[#allocation20_spill] sm:$0xff] }
 0x3ea   : > { %3480 = vmatprep.subr.bf16.mxu0 %v4686_v36 }
 0x3ec   : > { %3006 = vmatmul.mubr.f32.gmra.mrb[52].mxu0 %v4687_v40 }
 0x3ed   : > { %3008 = vmatprep.mubr.f32.mxu0 %v4688_v57  ;;  %3482 = vmatpush3.bf16.msra.mxu0 %v4686_v36  ;;  %v1466_v36 = vmul.f32 %v4326_v55, %v4151_v51 }
 0x3ee   : > { %3484 = vmatprep.subr.bf16.mxu0 %v4689_v28 }
 0x3f0   : > { %3009 = vmatmul.mubr.f32.gmra.mrb[54].mxu0 %v4690_v13 }
 0x3f1   : > { %3011 = vmatprep.mubr.f32.mxu0 %v4691_v44  ;;  %3486 = vmatpush3.bf16.msra.mxu0 %v4689_v28 }
 0x3f2   : > { %3488 = vmatprep.subr.bf16.mxu0 %v4692_v14 }
 0x3f4   : > { %3012 = vmatmul.mubr.f32.gmra.mrb[56].mxu0 %v4693_v7 }
 0x3f5   : > { %3014 = vmatprep.mubr.f32.mxu0 %v4694_v46  ;;  %3490 = vmatpush3.bf16.msra.mxu0 %v4692_v14 }
 0x3f6   : > { %3492 = vmatprep.subr.bf16.mxu0 %v4695_v30 }
 0x3f8   : > { %3015 = vmatmul.mubr.f32.gmra.mrb[58].mxu0 %v4696_v17 }
 0x3f9   : > { %3017 = vmatprep.mubr.f32.mxu0 %v4697_v0  ;;  %3494 = vmatpush3.bf16.msra.mxu0 %v4695_v30 }
 0x3fa   : > { %3496 = vmatprep.subr.bf16.mxu0 %v4698_v29 }
 0x3fc   : > { %3018 = vmatmul.mubr.f32.gmra.mrb[60].mxu0 %v4699_v53 }
 0x3fd   : > { %3020 = vmatprep.mubr.f32.mxu0 %v4700_v45  ;;  %3498 = vmatpush3.bf16.msra.mxu0 %v4698_v29 }
 0x3fe   : > { %3500 = vmatprep.subr.bf16.mxu0 %v4701_v2 }
 0x400   : > { %3021 = vmatmul.mubr.f32.gmra.mrb[62].mxu0 %v4702_v32 }
 0x401   : > { %3502 = vmatpush3.bf16.msra.mxu0 %v4701_v2  ;;  %v1465_v2 = vmul.f32 %v4326_v55, %v4153_v27  ;;  %v1467_v27 = vmul.f32 %v4326_v55, %v4167_v56  ;;  %v1469_v56 = vmul.f32 %v4326_v55, %v4182_v15  ;;  %v1471_v15 = vmul.f32 %v4326_v55, %v4198_v4 }
 0x496   : > { %v2945_v23 = vpop.f32.mrb[32].mxu1 }
 0x497   : > { %v1204_v8 = vpop.f32.mrb[33].mxu1 }
 0x49a   : > { %v2948_v59 = vpop.f32.mrb[34].mxu1 }
 0x49b   : > { %v1214_v62 = vpop.f32.mrb[35].mxu1 }
 0x49e   : > { %v2951_v61 = vpop.f32.mrb[36].mxu1 }
 0x49f   : > { %v1224_v35 = vpop.f32.mrb[37].mxu1 }
 0x4a2   : > { %v2954_v12 = vpop.f32.mrb[38].mxu1 }
 0x4a3   : > { %v1234_v19 = vpop.f32.mrb[39].mxu1 }
 0x4a6   : > { %v4309_v20 = vpop.f32.mrb[40].mxu1 }
 0x4a7   : > { %v4311_v5 = vpop.f32.mrb[41].mxu1 }
 0x4aa   : > { %v4313_v60 = vpop.f32.mrb[42].mxu1 }
 0x4ab   : > { %v4315_v10 = vpop.f32.mrb[43].mxu1 }
 0x4ae   : > { %v4317_v22 = vpop.f32.mrb[44].mxu1 }
 0x4af   : > { %v4319_v58 = vpop.f32.mrb[45].mxu1 }
 0x4b2   : > { %v4321_v11 = vpop.f32.mrb[46].mxu1 }
 0x4b3   : > { %v4323_v52 = vpop.f32.mrb[47].mxu1 }
 0x4b7   : > { %v3001_v24 = vpop.f32.mrb[48].mxu0 }
 0x4b8   : > { %v1355_v16 = vadd.f32 %v3001_v24, %v4137_v34  ;;  %v1349_v37 = vpop.f32.mrb[49].mxu0 }
 0x4b9   : > { %v1350_v21 = vadd.f32 %v4137_v34, %v1349_v37 }
 0x4ba   : > { %v1429_v43 = vsub.f32 %v1355_v16, %v2945_v23 }
 0x4bb   : > { %v1428_v39 = vsub.f32 %v1350_v21, %v1204_v8  ;;  %v3004_v26 = vpop.f32.mrb[50].mxu0 }
 0x4bc   : > { %v1445_v9 = vmax.f32 %v1429_v43, 0.0  ;;  %v1365_v28 = vadd.f32 %v3004_v26, %v4137_v34  ;;  %v1359_v14 = vpop.f32.mrb[51].mxu0  ;;  %v1468_v43 = vmul.f32 %v4326_v55, %v4165_v54 }
 0x4bd   : > { %v1444_v30 = vmax.f32 %v1428_v39, 0.0  ;;  %v1360_v29 = vadd.f32 %v4137_v34, %v1359_v14 }
 0x4be   : > { %v4335_v24 = vadd.f32 %v1466_v36, %v1445_v9  ;;  %v1431_v32 = vsub.f32 %v1365_v28, %v2948_v59 }
 0x4bf   : > { %v1430_v37 = vsub.f32 %v1360_v29, %v1214_v62  ;;  %v3007_v23 = vpop.f32.mrb[52].mxu0  ;;  %v4337_v8 = vadd.f32 %v1465_v2, %v1444_v30  ;;  %v1470_v30 = vmul.f32 %v4326_v55, %v4179_v3 }
 0x4c0   : > { %v1447_v16 = vmax.f32 %v1431_v32, 0.0  ;;  %v1375_v21 = vadd.f32 %v3007_v23, %v4137_v34  ;;  %v1369_v51 = vpop.f32.mrb[53].mxu0 }
 0x4c1   : > { %v1446_v39 = vmax.f32 %v1430_v37, 0.0  ;;  %v1370_v26 = vadd.f32 %v4137_v34, %v1369_v51  ;;  %3055 = vmatprep.mubr.f32.mxu1 %v4337_v8 }
 0x4c2   : > { %v1433_v59 = vsub.f32 %v1375_v21, %v2951_v61  ;;  %3056 = vmatmul.mubr.f32.vlgmr.msra.gmra.mrb[48].mxu1 %v4335_v24  ;;  %v4347_v62 = vadd.f32 %v1468_v43, %v1447_v16  ;;  %v1472_v43 = vmul.f32 %v4326_v55, %v4195_v25 }
 0x4c3   : > { %v1432_v32 = vsub.f32 %v1370_v26, %v1224_v35  ;;  %v3010_v9 = vpop.f32.mrb[54].mxu0  ;;  %v4349_v36 = vadd.f32 %v1467_v27, %v1446_v39 }
 0x4c4   : > { %v1449_v28 = vmax.f32 %v1433_v59, 0.0  ;;  %v1385_v54 = vadd.f32 %v3010_v9, %v4137_v34  ;;  %v1379_v14 = vpop.f32.mrb[55].mxu0 }
 0x4c5   : > { %v1448_v29 = vmax.f32 %v1432_v32, 0.0  ;;  %v1380_v2 = vadd.f32 %v4137_v34, %v1379_v14  ;;  %3058 = vmatprep.mubr.f32.mxu1 %v4349_v36 }
 0x4c6   : > { %v1435_v61 = vsub.f32 %v1385_v54, %v2954_v12  ;;  %3059 = vmatmul.mubr.f32.gmra.mrb[50].mxu1 %v4347_v62  ;;  %v4359_v35 = vadd.f32 %v1470_v30, %v1449_v28  ;;  %v1474_v54 = vmul.f32 %v4326_v55, %v4211_v33 }
 0x4c7   : > { %v1434_v37 = vsub.f32 %v1380_v2, %v1234_v19  ;;  %v3013_v23 = vpop.f32.mrb[56].mxu0  ;;  %v4361_v16 = vadd.f32 %v1469_v56, %v1448_v29 }
 0x4c8   : > { %v1451_v21 = vmax.f32 %v1435_v61, 0.0  ;;  %v1395_v3 = vadd.f32 %v3013_v23, %v4137_v34  ;;  %v1389_v51 = vpop.f32.mrb[57].mxu0  ;;  %v1476_v23 = vmul.f32 %v4326_v55, %v4227_v41 }
 0x4c9   : > { %v1450_v39 = vmax.f32 %v1434_v37, 0.0  ;;  %v1390_v26 = vadd.f32 %v4137_v34, %v1389_v51  ;;  %3061 = vmatprep.mubr.f32.mxu1 %v4361_v16 }
 0x4ca   : > { %v1437_v12 = vsub.f32 %v1395_v3, %v4309_v20  ;;  %3062 = vmatmul.mubr.f32.gmra.mrb[52].mxu1 %v4359_v35  ;;  %v4372_v19 = vadd.f32 %v1472_v43, %v1451_v21  ;;  %v1473_v20 = vmul.f32 %v4326_v55, %v4214_v18 }
 0x4cb   : > { %v1436_v27 = vsub.f32 %v1390_v26, %v4311_v5  ;;  %v3016_v59 = vpop.f32.mrb[58].mxu0  ;;  %v4375_v32 = vadd.f32 %v1471_v15, %v1450_v39 }
 0x4cc   : > { %v1453_v25 = vmax.f32 %v1437_v12, 0.0  ;;  %v1405_v9 = vadd.f32 %v3016_v59, %v4137_v34  ;;  %v1399_v28 = vpop.f32.mrb[59].mxu0  ;;  %v1478_v12 = vmul.f32 %v4326_v55, %v4243_v50  ;;  %v1480_v50 = vmul.f32 %v4326_v55, %v4256_v6 }
 0x4cd   : > { %v1452_v14 = vmax.f32 %v1436_v27, 0.0  ;;  %v1400_v4 = vadd.f32 %v4137_v34, %v1399_v28  ;;  %3064 = vmatprep.mubr.f32.mxu1 %v4375_v32 }
 0x4ce   : > { %v1439_v5 = vsub.f32 %v1405_v9, %v4313_v60  ;;  %3065 = vmatmul.mubr.f32.gmra.mrb[54].mxu1 %v4372_v19  ;;  %v4386_v30 = vadd.f32 %v1474_v54, %v1453_v25  ;;  %v1475_v60 = vmul.f32 %v4326_v55, %v4230_v49 }
 0x4cf   : > { %v1438_v29 = vsub.f32 %v1400_v4, %v4315_v10  ;;  %v3019_v2 = vpop.f32.mrb[60].mxu0  ;;  %v4389_v56 = vadd.f32 %v1473_v20, %v1452_v14 }
 0x4d0   : > { %v1455_v33 = vmax.f32 %v1439_v5, 0.0  ;;  %v1415_v61 = vadd.f32 %v3019_v2, %v4137_v34  ;;  %v1409_v37 = vpop.f32.mrb[61].mxu0 }
 0x4d1   : > { %v1454_v21 = vmax.f32 %v1438_v29, 0.0  ;;  %v1410_v18 = vadd.f32 %v4137_v34, %v1409_v37  ;;  %3067 = vmatprep.mubr.f32.mxu1 %v4389_v56 }
 0x4d2   : > { %v1441_v10 = vsub.f32 %v1415_v61, %v4317_v22  ;;  %3068 = vmatmul.mubr.f32.gmra.mrb[56].mxu1 %v4386_v30  ;;  %v4400_v3 = vadd.f32 %v1476_v23, %v1455_v33  ;;  %v1477_v22 = vmul.f32 %v4326_v55, %v4246_v63  ;;  %v1479_v63 = vmul.f32 %v4326_v55, %v4258_v48 }
 0x4d3   : > { %v1440_v51 = vsub.f32 %v1410_v18, %v4319_v58  ;;  %v3022_v43 = vpop.f32.mrb[62].mxu0  ;;  %v4403_v39 = vadd.f32 %v1475_v60, %v1454_v21 }
 0x4d4   : > { %v1457_v41 = vmax.f32 %v1441_v10, 0.0  ;;  %v1425_v26 = vadd.f32 %v3022_v43, %v4137_v34  ;;  %v1419_v15 = vpop.f32.mrb[63].mxu0 }
 0x4d5   : > { %v1456_v27 = vmax.f32 %v1440_v51, 0.0  ;;  %v1420_v49 = vadd.f32 %v4137_v34, %v1419_v15  ;;  %3070 = vmatprep.mubr.f32.mxu1 %v4403_v39 }
 0x4d6   : > { %v1443_v58 = vsub.f32 %v1425_v26, %v4321_v11  ;;  %3071 = vmatmul.mubr.f32.gmra.mrb[58].mxu1 %v4400_v3  ;;  %v4414_v59 = vadd.f32 %v1478_v12, %v1457_v41 }
 0x4d7   : > { %v1442_v25 = vsub.f32 %v1420_v49, %v4323_v52  ;;  %v4417_v9 = vadd.f32 %v1477_v22, %v1456_v27  ;;  %v2010_v27 = vld [vmem:[#allocation2 + $0x158] sm:$0xff]  ;;  %v2011_v22 = vld [vmem:[#allocation2 + $0x160] sm:$0xff] }
 0x4d8   : > { %v1459_v28 = vmax.f32 %v1443_v58, 0.0  ;;  %v2012_v58 = vld [vmem:[#allocation2 + $0x168] sm:$0xff] }
 0x4d9   : > { %v1458_v54 = vmax.f32 %v1442_v25, 0.0  ;;  %3073 = vmatprep.mubr.f32.mxu1 %v4417_v9  ;;  %v3555_v25 = vpack.c.bf16 %v2012_v58, %v2011_v22 }
 0x4da   : > { %3074 = vmatmul.mubr.f32.gmra.mrb[60].mxu1 %v4414_v59  ;;  %v4425_v11 = vadd.f32 %v1480_v50, %v1459_v28  ;;  %v2013_v28 = vld [vmem:[#allocation2 + $0x170] sm:$0xff]  ;;  %v2014_v50 = vld [vmem:[#allocation2 + $0x178] sm:$0xff] }
 0x4db   : > { %v4427_v14 = vadd.f32 %v1479_v63, %v1458_v54  ;;  %v3559_v54 = vpack.c.bf16 %v2014_v50, %v2013_v28  ;;  %v2015_v63 = vld [vmem:[#allocation2 + $0x180] sm:$0xff] }
 0x4dd   : > { %3076 = vmatprep.mubr.f32.mxu1 %v4427_v14 }
 0x4de   : > { %3077 = vmatmul.mubr.f32.gmra.mrb[62].mxu1 %v4425_v11 }
 0x4df   : > { %3167 = vmatprep.mubr.f32.mxu1 %v4024_v1 }
 0x595   : > { %v3057_v52 = vpop.f32.mrb[48].mxu1 }
 0x596   : > { %v1563_v6 = vpop.f32.mrb[49].mxu1 }
 0x597   : > { %v3503_v4 = vpack.c.bf16 %v3057_v52, %v1563_v6  ;;  %3111 = vmatprep.mubr.f32.mxu0 %v1563_v6 }
 0x598   : > { %3112 = vmatmul.mubr.f32.vlgmr.msra.gmra.mrb[64].mxu0 %v3057_v52  ;;  %v2016_v52 = vld [vmem:[#allocation2 + $0x188] sm:$0xff] }
 0x599   : > { %v3060_v20 = vpop.f32.mrb[50].mxu1  ;;  %3504 = vmatprep.subr.bf16.mxu1 %v3503_v4  ;;  %v3563_v6 = vpack.c.bf16 %v2016_v52, %v2015_v63 }
 0x59a   : > { %v1573_v48 = vpop.f32.mrb[51].mxu1  ;;  %3506 = vmatpush3.bf16.msra.mxu1 %v3503_v4 }
 0x59b   : > { %v3507_v55 = vpack.c.bf16 %v3060_v20, %v1573_v48  ;;  %3114 = vmatprep.mubr.f32.mxu0 %v1573_v48 }
 0x59c   : > { %3115 = vmatmul.mubr.f32.gmra.mrb[66].mxu0 %v3060_v20 }
 0x59d   : > { %v3063_v5 = vpop.f32.mrb[52].mxu1  ;;  %3508 = vmatprep.subr.bf16.mxu1 %v3507_v55 }
 0x59e   : > { %v1583_v29 = vpop.f32.mrb[53].mxu1  ;;  %3510 = vmatpush3.bf16.msra.mxu1 %v3507_v55 }
 0x59f   : > { %v3511_v2 = vpack.c.bf16 %v3063_v5, %v1583_v29  ;;  %3117 = vmatprep.mubr.f32.mxu0 %v1583_v29 }
 0x5a0   : > { %3118 = vmatmul.mubr.f32.gmra.mrb[68].mxu0 %v3063_v5 }
 0x5a1   : > { %v3066_v1 = vpop.f32.mrb[54].mxu1  ;;  %3512 = vmatprep.subr.bf16.mxu1 %v3511_v2 }
 0x5a2   : > { %v1593_v33 = vpop.f32.mrb[55].mxu1  ;;  %3514 = vmatpush3.bf16.msra.mxu1 %v3511_v2 }
 0x5a3   : > { %v3515_v61 = vpack.c.bf16 %v3066_v1, %v1593_v33  ;;  %3120 = vmatprep.mubr.f32.mxu0 %v1593_v33 }
 0x5a4   : > { %3121 = vmatmul.mubr.f32.gmra.mrb[70].mxu0 %v3066_v1 }
 0x5a5   : > { %v3069_v37 = vpop.f32.mrb[56].mxu1  ;;  %3516 = vmatprep.subr.bf16.mxu1 %v3515_v61 }
 0x5a6   : > { %v1603_v23 = vpop.f32.mrb[57].mxu1  ;;  %3518 = vmatpush3.bf16.msra.mxu1 %v3515_v61 }
 0x5a7   : > { %v3519_v21 = vpack.c.bf16 %v3069_v37, %v1603_v23  ;;  %3123 = vmatprep.mubr.f32.mxu0 %v1603_v23 }
 0x5a8   : > { %3124 = vmatmul.mubr.f32.gmra.mrb[72].mxu0 %v3069_v37 }
 0x5a9   : > { %v3072_v18 = vpop.f32.mrb[58].mxu1  ;;  %3520 = vmatprep.subr.bf16.mxu1 %v3519_v21 }
 0x5aa   : > { %v1613_v60 = vpop.f32.mrb[59].mxu1  ;;  %3522 = vmatpush3.bf16.msra.mxu1 %v3519_v21 }
 0x5ab   : > { %v3523_v10 = vpack.c.bf16 %v3072_v18, %v1613_v60  ;;  %3126 = vmatprep.mubr.f32.mxu0 %v1613_v60 }
 0x5ac   : > { %3127 = vmatmul.mubr.f32.gmra.mrb[74].mxu0 %v3072_v18 }
 0x5ad   : > { %v3075_v51 = vpop.f32.mrb[60].mxu1  ;;  %3524 = vmatprep.subr.bf16.mxu1 %v3523_v10 }
 0x5ae   : > { %v1623_v43 = vpop.f32.mrb[61].mxu1  ;;  %3526 = vmatpush3.bf16.msra.mxu1 %v3523_v10 }
 0x5af   : > { %v3527_v41 = vpack.c.bf16 %v3075_v51, %v1623_v43  ;;  %3129 = vmatprep.mubr.f32.mxu0 %v1623_v43 }
 0x5b0   : > { %3130 = vmatmul.mubr.f32.gmra.mrb[76].mxu0 %v3075_v51 }
 0x5b1   : > { %v3078_v26 = vpop.f32.mrb[62].mxu1  ;;  %3528 = vmatprep.subr.bf16.mxu1 %v3527_v41 }
 0x5b2   : > { %v1633_v15 = vpop.f32.mrb[63].mxu1  ;;  %3530 = vmatpush3.bf16.msra.mxu1 %v3527_v41 }
 0x5b3   : > { %v3531_v12 = vpack.c.bf16 %v3078_v26, %v1633_v15  ;;  %3132 = vmatprep.mubr.f32.mxu0 %v1633_v15 }
 0x5b4   : > { %3133 = vmatmul.mubr.f32.gmra.mrb[78].mxu0 %v3078_v26  ;;  %v4464_v26 = vld [vmem:[#allocation2 + $0xc] ss:$0 sm:$0xff] }
 0x5b5   : > { %3532 = vmatprep.subr.bf16.mxu1 %v3531_v12  ;;  %v1971_v28 = vmul.f32 %v4464_v26, %v4349_v36  ;;  %v1973_v36 = vmul.f32 %v4464_v26, %v4361_v16 }
 0x5b6   : > { %3534 = vmatpush3.bf16.msra.mxu1 %v3531_v12 }
 0x5b9   : > { %3168 = vmatmul.mubr.f32.vlgmr.msra.gmra.mrb[64].mxu1 %v4043_v38  ;;  %v4703_v38 = vld [vmem:[#allocation25_spill] sm:$0xff] }
 0x5ba   : > { %3170 = vmatprep.mubr.f32.mxu1 %v4046_v42  ;;  %v2001_v42 = vld [vmem:[#allocation2 + $0x110] sm:$0xff] }
 0x5bd   : > { %3171 = vmatmul.mubr.f32.gmra.mrb[66].mxu1 %v4052_v47  ;;  %v2002_v47 = vld [vmem:[#allocation2 + $0x118] sm:$0xff] }
 0x5be   : > { %3173 = vmatprep.mubr.f32.mxu1 %v4685_v31  ;;  %v3535_v31 = vpack.c.bf16 %v2002_v47, %v2001_v42 }
 0x5c0   : > { %3536 = vmatprep.subr.bf16.mxu0 %v3535_v31 }
 0x5c1   : > { %3174 = vmatmul.mubr.f32.gmra.mrb[68].mxu1 %v4687_v40  ;;  %3538 = vmatpush3.bf16.msra.mxu0 %v3535_v31  ;;  %v2003_v40 = vld [vmem:[#allocation2 + $0x120] sm:$0xff]  ;;  %v1970_v31 = vmul.f32 %v4464_v26, %v4335_v24  ;;  %v1972_v24 = vmul.f32 %v4464_v26, %v4347_v62  ;;  %v1974_v62 = vmul.f32 %v4464_v26, %v4359_v35 }
 0x5c2   : > { %3176 = vmatprep.mubr.f32.mxu1 %v4688_v57  ;;  %v2004_v57 = vld [vmem:[#allocation2 + $0x128] sm:$0xff] }
 0x5c5   : > { %3177 = vmatmul.mubr.f32.gmra.mrb[70].mxu1 %v4690_v13  ;;  %v3539_v13 = vpack.c.bf16 %v2004_v57, %v2003_v40 }
 0x5c6   : > { %3179 = vmatprep.mubr.f32.mxu1 %v4691_v44  ;;  %v2005_v44 = vld [vmem:[#allocation2 + $0x130] sm:$0xff] }
 0x5c7   : > { %3540 = vmatprep.subr.bf16.mxu0 %v3539_v13 }
 0x5c8   : > { %3542 = vmatpush3.bf16.msra.mxu0 %v3539_v13 }
 0x5c9   : > { %3180 = vmatmul.mubr.f32.gmra.mrb[72].mxu1 %v4693_v7  ;;  %v2006_v7 = vld [vmem:[#allocation2 + $0x138] sm:$0xff] }
 0x5ca   : > { %3182 = vmatprep.mubr.f32.mxu1 %v4694_v46  ;;  %v3543_v46 = vpack.c.bf16 %v2006_v7, %v2005_v44  ;;  %v1969_v7 = vmul.f32 %v4464_v26, %v4337_v8 }
 0x5cc   : > { %3544 = vmatprep.subr.bf16.mxu0 %v3543_v46 }
 0x5cd   : > { %3183 = vmatmul.mubr.f32.gmra.mrb[74].mxu1 %v4696_v17  ;;  %3546 = vmatpush3.bf16.msra.mxu0 %v3543_v46  ;;  %v2007_v17 = vld [vmem:[#allocation2 + $0x140] sm:$0xff] }
 0x5ce   : > { %3185 = vmatprep.mubr.f32.mxu1 %v4697_v0  ;;  %v2008_v0 = vld [vmem:[#allocation2 + $0x148] sm:$0xff] }
 0x5d1   : > { %3186 = vmatmul.mubr.f32.gmra.mrb[76].mxu1 %v4699_v53  ;;  %v3547_v53 = vpack.c.bf16 %v2008_v0, %v2007_v17 }
 0x5d2   : > { %3188 = vmatprep.mubr.f32.mxu1 %v4700_v45  ;;  %v2009_v45 = vld [vmem:[#allocation2 + $0x150] sm:$0xff] }
 0x5d3   : > { %3548 = vmatprep.subr.bf16.mxu0 %v3547_v53  ;;  %v3551_v49 = vpack.c.bf16 %v2010_v27, %v2009_v45 }
 0x5d4   : > { %3550 = vmatpush3.bf16.msra.mxu0 %v3547_v53 }
 0x5d5   : > { %3189 = vmatmul.mubr.f32.gmra.mrb[78].mxu1 %v4703_v38  ;;  %3552 = vmatprep.subr.bf16.mxu0 %v3551_v49 }
 0x5d8   : > { %3554 = vmatpush3.bf16.msra.mxu0 %v3551_v49 }
 0x5d9   : > { %3556 = vmatprep.subr.bf16.mxu0 %v3555_v25 }
 0x5dc   : > { %3558 = vmatpush3.bf16.msra.mxu0 %v3555_v25 }
 0x5dd   : > { %3560 = vmatprep.subr.bf16.mxu0 %v3559_v54 }
 0x5e0   : > { %3562 = vmatpush3.bf16.msra.mxu0 %v3559_v54 }
 0x5e1   : > { %3564 = vmatprep.subr.bf16.mxu0 %v3563_v6 }
 0x5e4   : > { %3566 = vmatpush3.bf16.msra.mxu0 %v3563_v6 }
 0x66b   : > { %v3113_v4 = vpop.f32.mrb[64].mxu0 }
 0x66c   : > { %v1708_v20 = vpop.f32.mrb[65].mxu0 }
 0x66f   : > { %v3116_v48 = vpop.f32.mrb[66].mxu0 }
 0x670   : > { %v1718_v55 = vpop.f32.mrb[67].mxu0 }
 0x673   : > { %v3119_v5 = vpop.f32.mrb[68].mxu0 }
 0x674   : > { %v1728_v29 = vpop.f32.mrb[69].mxu0 }
 0x677   : > { %v3122_v2 = vpop.f32.mrb[70].mxu0 }
 0x678   : > { %v1738_v1 = vpop.f32.mrb[71].mxu0 }
 0x67b   : > { %v4447_v33 = vpop.f32.mrb[72].mxu0 }
 0x67c   : > { %v4449_v61 = vpop.f32.mrb[73].mxu0 }
 0x67f   : > { %v4451_v37 = vpop.f32.mrb[74].mxu0 }
 0x680   : > { %v4453_v23 = vpop.f32.mrb[75].mxu0 }
 0x683   : > { %v4455_v21 = vpop.f32.mrb[76].mxu0 }
 0x684   : > { %v4457_v18 = vpop.f32.mrb[77].mxu0 }
 0x687   : > { %v4459_v60 = vpop.f32.mrb[78].mxu0 }
 0x688   : > { %v4461_v10 = vpop.f32.mrb[79].mxu0 }
 0x68c   : > { %v3169_v51 = vpop.f32.mrb[64].mxu1 }
 0x68d   : > { %v1859_v43 = vadd.f32 %v3169_v51, %v4137_v34  ;;  %v1853_v41 = vpop.f32.mrb[65].mxu1 }
 0x68e   : > { %v1854_v15 = vadd.f32 %v4137_v34, %v1853_v41 }
 0x68f   : > { %v1933_v12 = vsub.f32 %v1859_v43, %v3113_v4 }
 0x690   : > { %v1932_v38 = vsub.f32 %v1854_v15, %v1708_v20  ;;  %v3172_v42 = vpop.f32.mrb[66].mxu1 }
 0x691   : > { %v1949_v47 = vmax.f32 %v1933_v12, 0.0  ;;  %v1869_v40 = vadd.f32 %v3172_v42, %v4137_v34  ;;  %v1863_v57 = vpop.f32.mrb[67].mxu1  ;;  %v1976_v42 = vmul.f32 %v4464_v26, %v4372_v19  ;;  %v1978_v19 = vmul.f32 %v4464_v26, %v4386_v30 }
 0x692   : > { %v1948_v13 = vmax.f32 %v1932_v38, 0.0  ;;  %v1864_v44 = vadd.f32 %v4137_v34, %v1863_v57  ;;  %v1980_v30 = vmul.f32 %v4464_v26, %v4400_v3  ;;  %v1982_v3 = vmul.f32 %v4464_v26, %v4414_v59 }
 0x693   : > { %v1986_v46 = vadd.f32 %v1970_v31, %v1949_v47  ;;  %v1935_v17 = vsub.f32 %v1869_v40, %v3116_v48  ;;  %v1975_v31 = vmul.f32 %v4464_v26, %v4375_v32  ;;  %v1977_v32 = vmul.f32 %v4464_v26, %v4389_v56 }
 0x694   : > { %v1934_v0 = vsub.f32 %v1864_v44, %v1718_v55  ;;  %v3175_v53 = vpop.f32.mrb[68].mxu1  ;;  %v1985_v45 = vadd.f32 %v1969_v7, %v1948_v13  ;;  %v3621_v55 = vld [vmem:[#allocation2 + $0x9] ss:$0 sm:$0xff]  ;;  %v1979_v56 = vmul.f32 %v4464_v26, %v4403_v39  ;;  %v1981_v39 = vmul.f32 %v4464_v26, %v4417_v9 }
 0x695   : > { %v1951_v27 = vmax.f32 %v1935_v17, 0.0  ;;  %v1879_v49 = vadd.f32 %v3175_v53, %v4137_v34  ;;  %v1873_v22 = vpop.f32.mrb[69].mxu1 }
 0x696   : > { %v1950_v58 = vmax.f32 %v1934_v0, 0.0  ;;  %v1874_v25 = vadd.f32 %v4137_v34, %v1873_v22  ;;  %3223 = vmatprep.mubr.f32.mxu0 %v1985_v45 }
 0x697   : > { %v1937_v8 = vsub.f32 %v1879_v49, %v3119_v5  ;;  %3224 = vmatmul.mubr.f32.vlgmr.msra.gmra.mrb[80].mxu0 %v1986_v46  ;;  %v1988_v50 = vadd.f32 %v1972_v24, %v1951_v27 }
 0x698   : > { %v1936_v54 = vsub.f32 %v1874_v25, %v1728_v29  ;;  %v3178_v63 = vpop.f32.mrb[70].mxu1  ;;  %v1987_v52 = vadd.f32 %v1971_v28, %v1950_v58 }
 0x699   : > { %v1953_v6 = vmax.f32 %v1937_v8, 0.0  ;;  %v1889_v4 = vadd.f32 %v3178_v63, %v4137_v34  ;;  %v1883_v20 = vpop.f32.mrb[71].mxu1 }
 0x69a   : > { %v1952_v48 = vmax.f32 %v1936_v54, 0.0  ;;  %v1884_v51 = vadd.f32 %v3621_v55, %v1883_v20  ;;  %3226 = vmatprep.mubr.f32.mxu0 %v1987_v52 }
 0x69b   : > { %v1939_v5 = vsub.f32 %v1889_v4, %v3122_v2  ;;  %3227 = vmatmul.mubr.f32.gmra.mrb[82].mxu0 %v1988_v50  ;;  %v1990_v43 = vadd.f32 %v1974_v62, %v1953_v6 }
 0x69c   : > { %v1938_v29 = vsub.f32 %v1884_v51, %v1738_v1  ;;  %v3181_v41 = vpop.f32.mrb[72].mxu1  ;;  %v1989_v15 = vadd.f32 %v1973_v36, %v1952_v48  ;;  %v1984_v48 = vmul.f32 %v4464_v26, %v4425_v11 }
 0x69d   : > { %v1955_v12 = vmax.f32 %v1939_v5, 0.0  ;;  %v1899_v38 = vadd.f32 %v3621_v55, %v3181_v41  ;;  %v1893_v34 = vpop.f32.mrb[73].mxu1 }
 0x69e   : > { %v1954_v35 = vmax.f32 %v1938_v29, 0.0  ;;  %v1894_v47 = vadd.f32 %v3621_v55, %v1893_v34  ;;  %3229 = vmatprep.mubr.f32.mxu0 %v1989_v15 }
 0x69f   : > { %v1941_v16 = vsub.f32 %v1899_v38, %v4447_v33  ;;  %3230 = vmatmul.mubr.f32.gmra.mrb[84].mxu0 %v1990_v43  ;;  %v1992_v2 = vadd.f32 %v1976_v42, %v1955_v12 }
 0x6a0   : > { %v1940_v1 = vsub.f32 %v1894_v47, %v4449_v61  ;;  %v3184_v40 = vpop.f32.mrb[74].mxu1  ;;  %v1991_v57 = vadd.f32 %v1975_v31, %v1954_v35 }
 0x6a1   : > { %v1957_v13 = vmax.f32 %v1941_v16, 0.0  ;;  %v1909_v44 = vadd.f32 %v3621_v55, %v3184_v40  ;;  %v1903_v7 = vpop.f32.mrb[75].mxu1 }
 0x6a2   : > { %v1956_v46 = vmax.f32 %v1940_v1, 0.0  ;;  %v1904_v17 = vadd.f32 %v3621_v55, %v1903_v7  ;;  %3232 = vmatprep.mubr.f32.mxu0 %v1991_v57 }
 0x6a3   : > { %v1943_v33 = vsub.f32 %v1909_v44, %v4451_v37  ;;  %3233 = vmatmul.mubr.f32.gmra.mrb[86].mxu0 %v1992_v2  ;;  %v1994_v0 = vadd.f32 %v1978_v19, %v1957_v13 }
 0x6a4   : > { %v1942_v61 = vsub.f32 %v1904_v17, %v4453_v23  ;;  %v3187_v53 = vpop.f32.mrb[76].mxu1  ;;  %v1993_v45 = vadd.f32 %v1977_v32, %v1956_v46 }
 0x6a5   : > { %v1959_v27 = vmax.f32 %v1943_v33, 0.0  ;;  %v1919_v49 = vadd.f32 %v3621_v55, %v3187_v53  ;;  %v1913_v22 = vpop.f32.mrb[77].mxu1 }
 0x6a6   : > { %v1958_v24 = vmax.f32 %v1942_v61, 0.0  ;;  %v1914_v58 = vadd.f32 %v3621_v55, %v1913_v22  ;;  %3235 = vmatprep.mubr.f32.mxu0 %v1993_v45 }
 0x6a7   : > { %v1945_v37 = vsub.f32 %v1919_v49, %v4455_v21  ;;  %3236 = vmatmul.mubr.f32.gmra.mrb[88].mxu0 %v1994_v0  ;;  %v1996_v25 = vadd.f32 %v1980_v30, %v1959_v27 }
 0x6a8   : > { %v1944_v23 = vsub.f32 %v1914_v58, %v4457_v18  ;;  %v3190_v28 = vpop.f32.mrb[78].mxu1  ;;  %v1995_v8 = vadd.f32 %v1979_v56, %v1958_v24 }
 0x6a9   : > { %v1961_v50 = vmax.f32 %v1945_v37, 0.0  ;;  %v1929_v54 = vadd.f32 %v3621_v55, %v3190_v28  ;;  %v1923_v63 = vpop.f32.mrb[79].mxu1 }
 0x6aa   : > { %v1960_v52 = vmax.f32 %v1944_v23, 0.0  ;;  %v1924_v6 = vadd.f32 %v3621_v55, %v1923_v63  ;;  %3238 = vmatprep.mubr.f32.mxu0 %v1995_v8  ;;  %v1983_v55 = vmul.f32 %v4464_v26, %v4427_v14 }
 0x6ab   : > { %v1947_v21 = vsub.f32 %v1929_v54, %v4459_v60  ;;  %3239 = vmatmul.mubr.f32.gmra.mrb[90].mxu0 %v1996_v25  ;;  %v1998_v18 = vadd.f32 %v1982_v3, %v1961_v50  ;;  %v2315_v60 = vld [vmem:[#allocation2 + $0xd] ss:$0 sm:$0xff] }
 0x6ac   : > { %v1946_v4 = vsub.f32 %v1924_v6, %v4461_v10  ;;  %v1997_v20 = vadd.f32 %v1981_v39, %v1960_v52 }
 0x6ad   : > { %v1963_v62 = vmax.f32 %v1947_v21, 0.0 }
 0x6ae   : > { %v1962_v59 = vmax.f32 %v1946_v4, 0.0  ;;  %3241 = vmatprep.mubr.f32.mxu0 %v1997_v20 }
 0x6af   : > { %3242 = vmatmul.mubr.f32.gmra.mrb[92].mxu0 %v1998_v18  ;;  %v2000_v9 = vadd.f32 %v1984_v48, %v1963_v62 }
 0x6b0   : > { %v1999_v51 = vadd.f32 %v1983_v55, %v1962_v59 }
 0x6b2   : > { %3244 = vmatprep.mubr.f32.mxu0 %v1999_v51 }
 0x6b3   : > { %3245 = vmatmul.mubr.f32.gmra.mrb[94].mxu0 %v2000_v9 }
 0x76a   : > { %v3225_v10 = vpop.f32.mrb[80].mxu0 }
 0x76b   : > { %v2094_v36 = vadd.f32 %v3225_v10, %v2315_v60  ;;  %v2088_v5 = vpop.f32.mrb[81].mxu0 }
 0x76c   : > { %v2089_v43 = vadd.f32 %v2315_v60, %v2088_v5 }
 0x76d   : > { %2168 = vst [vmem:[%s4515_s5 + $0x8] sm:$0xff] %v2094_v36 }
 0x76e   : > { %2167 = vst [vmem:[%s4515_s5] sm:$0xff] %v2089_v43  ;;  %v3228_v11 = vpop.f32.mrb[82].mxu0 }
 0x76f   : > { %v2104_v14 = vadd.f32 %v3228_v11, %v2315_v60  ;;  %v2098_v26 = vpop.f32.mrb[83].mxu0 }
 0x770   : > { %v2099_v29 = vadd.f32 %v2315_v60, %v2098_v26 }
 0x771   : > { %2170 = vst [vmem:[%s4515_s5 + $0x18] sm:$0xff] %v2104_v14 }
 0x772   : > { %2169 = vst [vmem:[%s4515_s5 + $0x10] sm:$0xff] %v2099_v29  ;;  %v3231_v41 = vpop.f32.mrb[84].mxu0 }
 0x773   : > { %v2114_v15 = vadd.f32 %v3231_v41, %v2315_v60  ;;  %v2108_v12 = vpop.f32.mrb[85].mxu0 }
 0x774   : > { %v2109_v38 = vadd.f32 %v2315_v60, %v2108_v12 }
 0x775   : > { %2172 = vst [vmem:[%s4515_s5 + $0x28] sm:$0xff] %v2114_v15 }
 0x776   : > { %2171 = vst [vmem:[%s4515_s5 + $0x20] sm:$0xff] %v2109_v38  ;;  %v3234_v34 = vpop.f32.mrb[86].mxu0 }
 0x777   : > { %v2124_v42 = vadd.f32 %v3234_v34, %v2315_v60  ;;  %v2118_v35 = vpop.f32.mrb[87].mxu0 }
 0x778   : > { %v2119_v47 = vadd.f32 %v2315_v60, %v2118_v35 }
 0x779   : > { %2174 = vst [vmem:[%s4515_s5 + $0x38] sm:$0xff] %v2124_v42 }
 0x77a   : > { %2173 = vst [vmem:[%s4515_s5 + $0x30] sm:$0xff] %v2119_v47  ;;  %v3237_v31 = vpop.f32.mrb[88].mxu0 }
 0x77b   : > { %v2134_v16 = vadd.f32 %v3237_v31, %v2315_v60  ;;  %v2128_v2 = vpop.f32.mrb[89].mxu0 }
 0x77c   : > { %v2129_v1 = vadd.f32 %v2315_v60, %v2128_v2 }
 0x77d   : > { %2176 = vst [vmem:[%s4515_s5 + $0x48] sm:$0xff] %v2134_v16 }
 0x77e   : > { %2175 = vst [vmem:[%s4515_s5 + $0x40] sm:$0xff] %v2129_v1  ;;  %v3240_v40 = vpop.f32.mrb[90].mxu0 }
 0x77f   : > { %v2144_v57 = vadd.f32 %v3240_v40, %v2315_v60  ;;  %v2138_v13 = vpop.f32.mrb[91].mxu0 }
 0x780   : > { %v2139_v44 = vadd.f32 %v2315_v60, %v2138_v13 }
 0x781   : > { %2178 = vst [vmem:[%s4515_s5 + $0x58] sm:$0xff] %v2144_v57 }
 0x782   : > { %2177 = vst [vmem:[%s4515_s5 + $0x50] sm:$0xff] %v2139_v44  ;;  %v3243_v7 = vpop.f32.mrb[92].mxu0 }
 0x783   : > { %v2154_v19 = vadd.f32 %v3243_v7, %v2315_v60  ;;  %v2148_v46 = vpop.f32.mrb[93].mxu0 }
 0x784   : > { %v2149_v17 = vadd.f32 %v2315_v60, %v2148_v46 }
 0x785   : > { %2180 = vst [vmem:[%s4515_s5 + $0x68] sm:$0xff] %v2154_v19 }
 0x786   : > { %2179 = vst [vmem:[%s4515_s5 + $0x60] sm:$0xff] %v2149_v17  ;;  %v3246_v32 = vpop.f32.mrb[94].mxu0 }
 0x787   : > { %v2164_v33 = vadd.f32 %v3246_v32, %v2315_v60  ;;  %v2158_v0 = vpop.f32.mrb[95].mxu0 }
 0x788   : > { %v2159_v61 = vadd.f32 %v2315_v60, %v2158_v0 }
 0x789   : > { %2182 = vst [vmem:[%s4515_s5 + $0x78] sm:$0xff] %v2164_v33 }
 0x78a   : > { %2181 = vst [vmem:[%s4515_s5 + $0x70] sm:$0xff] %v2159_v61 }
 0x78b   : > { %3663 = shalt.err (!%p3660_p7)
}
 0x78c   : > { %s3664_s25 = scalar_lea.hbm %s4536_s10, 2048  ;;  %s3668_s27 = scalar_lea.hbm %s4588_s3, 4096 }
 0x78d   : > { %p3665_p8 = scmp.ne.s32.totalorder %s4536_s10, %s3664_s25  ;;  %p3669_p1 = scmp.lt.u32.totalorder %s4536_s10, %s4588_s3 }
 0x78e   : > { %p3670_p0 = scmp.lt.u32.totalorder %s3668_s27, %s3664_s25  ;;  %p3672_p6 = scmp.lt.u32.totalorder %s3664_s25, %s4536_s10 }
 0x78f   : > { %p3666_p11 = pnand %p3665_p8, %p4704_p9 }
 0x790   : > { %p3671_p5 = por %p3670_p0, %p3669_p1 }
 0x791   : > { %p3667_p13 = pneg %p3666_p11 }
 0x792   : > { %p3673_p10 = por %p3672_p6, %p3671_p5 }
 0x794   : > { %p3674_p12 = pnand %p3673_p10, %p3667_p13 }
 0x796   : > { %3677 = shalt.err (!%p3674_p12)
}
 0x797   : > { %s3722_s30 = smov 128   ;;  %s3723_s4 = smov 8  }
 0x798   : > { %3571 = dma.vmem_to_hbm [thread:$0]  (%p4704_p9), %s4538_s7, 2048, %s4536_s10, %s4544_s16, %s3722_s30, %s3722_s30, %s3723_s4  }
 0x799 PF: > { %p3583_p2 = scmp.ge.s32.totalorder %s3716_s15, 2  ;;  %s2212_s5 = sand.u32 1, %s3704_s12  }
 0x79a   : > { %p4705_p3 = scmp.ne.s32.totalorder %s4645_s23, 0  ;;  %s2213_s6 = scalar_lea.sflag [#allocation4], %s2212_s5 }
 0x79c   : > { %p3578_p4 = pnand %p3583_p2, %p4705_p3 }
 0x79e   : > { %3699 = dma.done.wait (!%p3578_p4), %s2213_s6, 2048  }
 0x79f   : > { %3701 = vsyncadd (!%p3578_p4), %s2213_s6, 4294965248  ;;  %p14_p7 = scmp.ge.s32.totalorder %s3769_s18, 4   ;;  %s4706_s12 = smov %s3708_s13 }
 0x7a0   : > { %s4707_s13 = smov %s3712_s14  ;;  %s4708_s14 = smov %s3780_s21 }
 0x7a1   : > { %s4709_s15 = smov %s3769_s18  ;;  %16 = sbr.rel (!%p14_p7) target bundleno = 4 (0x4), region = 75 }
 0x7a8   :  { %2218 = vsyncpa [#allocation3], 1 }
 0x7a9   :  { %2220 = vsyncpa [#allocation3 + $0x1], 1 }
 0x7aa   :  { %2221 = vsyncpa [#allocation4], 1 }
 0x7ab   :  { %2223 = vsyncpa [#allocation4 + $0x1], 1 }

</bundles_post_ra>
